<compile_context>
chip_gen: v7x
topology: tpu7x:2x2x1
jax: 0.10.0
libtpu: 0.0.40
codegen_flags: <defaults>
</compile_context>

<pallas_src>
import jax
import jax.numpy as jnp
from jax.experimental import pallas as pl
from jax.experimental.pallas import tpu as pltpu


def _convt1x1_relu_kernel(x_ref, w_ref, b_ref, o_ref):
    # x_ref: (N, Cin, H, W)        VMEM
    # w_ref: (Cin, Cout)           SMEM (scalars)
    # b_ref: (Cout,)               SMEM (scalars)
    # o_ref: (N, Cout, Hout, Wout) VMEM  -- NCHW directly, no wrapper transpose
    N, Cin, H, W = x_ref.shape
    _, Cout, Hout, Wout = o_ref.shape

    for n in range(N):
        # Aligned full-plane loads; the (i+1, j+1) shift is realized with XLU
        # rolls (lane + sublane rotation). roll(x, n-1) == roll(x, -1), i.e.
        # rolled[i] = x[(i+1) mod n]; the wrapped row/column lands only in the
        # discarded tail (i == H-1 / j == W-1), so the [:Hout, :Wout] window is
        # exactly x[n, ci, 1:, 1:].
        xs = []
        for ci in range(Cin):
            plane = x_ref[n, ci, :, :]                  # (H, W), aligned vld
            plane = pltpu.roll(plane, W - 1, axis=1)    # lane roll:    [., j] <- [., j+1]
            plane = pltpu.roll(plane, H - 1, axis=0)    # sublane roll: [i, .] <- [i+1, .]
            xs.append(plane)

        for co in range(Cout):
            # First FMA initializes the accumulator; bias is folded into the
            # epilogue (no separate broadcast splat per output channel).
            acc = xs[0] * w_ref[0, co]
            for ci in range(1, Cin):
                acc = acc + xs[ci] * w_ref[ci, co]
            full = jnp.maximum(acc + b_ref[co], 0.0)    # (H, W), aligned compute
            # Aligned-origin store of the valid (Hout, Wout) window: only tail
            # lanes/sublanes are masked, no relayout copy.
            o_ref[n, co, :, :] = full[:Hout, :Wout].astype(o_ref.dtype)


def conv_transpose_1x1_relu(x_nchw, weight, bias):
    """x_nchw: (N, Cin, H, W); weight: (Cin, Cout) (torch weight (Cin,Cout,1,1)
    squeezed, NOT transposed); bias: (Cout,). Returns NCHW (N, Cout, H-1, W-1)."""
    N, Cin, H, W = x_nchw.shape
    Cout = weight.shape[1]
    Hout, Wout = H - 1, W - 1  # (H-1)*1 - 2*1 + 0 + 1 + 1

    # Whole-problem-resident VMEM budget guard (roughly 44*N*H*W bytes with
    # double-buffering headroom); tile over N/H before approaching v7x's 64 MiB.
    resident_bytes = 4 * (N * Cin * H * W + N * Cout * Hout * Wout)
    assert resident_bytes < 24 * 1024 * 1024, (
        "gridless design exceeds safe VMEM budget; add a grid over N/H")

    return pl.pallas_call(
        _convt1x1_relu_kernel,
        out_shape=jax.ShapeDtypeStruct((N, Cout, Hout, Wout), x_nchw.dtype),
        in_specs=[
            pl.BlockSpec(memory_space=pltpu.MemorySpace.VMEM),   # x (full, aligned)
            pl.BlockSpec(memory_space=pltpu.MemorySpace.SMEM),   # weight scalars
            pl.BlockSpec(memory_space=pltpu.MemorySpace.SMEM),   # bias scalars
        ],
        out_specs=pl.BlockSpec(memory_space=pltpu.MemorySpace.VMEM),
    )(x_nchw, weight, bias)


if __name__ == "__main__":
    key = jax.random.PRNGKey(0)
    k_x, k_w, k_b = jax.random.split(key, 3)

    # Shapes implied by the original module: x1 = torch.randn(1, 3, 64, 64)
    N, Cin, H, W = 1, 3, 64, 64
    Cout = 8

    x = jax.random.normal(k_x, (N, Cin, H, W), dtype=jnp.float32)
    # ConvTranspose2d weight in torch is (Cin, Cout, 1, 1); squeeze -> (Cin, Cout)
    bound = 1.0 / (Cin ** 0.5)
    weight = jax.random.uniform(k_w, (Cin, Cout), jnp.float32, -bound, bound)
    bias = jax.random.uniform(k_b, (Cout,), jnp.float32, -bound, bound)

    out = conv_transpose_1x1_relu(x, weight, bias)
    jax.block_until_ready(out)

    # Shape / semantics sanity check vs a plain-JAX reference.
    ref = jnp.maximum(
        jnp.einsum("nchw,cd->ndhw", x[:, :, 1:, 1:], weight)
        + bias[None, :, None, None],
        0.0,
    )
    assert out.shape == (N, Cout, H - 1, W - 1), out.shape
    assert jnp.allclose(out, ref, atol=1e-5), "mismatch vs reference"

    print("KERNEL_OK")
</pallas_src>

<mosaic_0001>
module attributes {stable_mosaic.version = 11 : i64} {
  func.func @_convt1x1_relu_kernel(%arg0: memref<1x3x64x64xf32, #tpu.memory_space<vmem>>, %arg1: memref<3x8xf32, #tpu.memory_space<smem>>, %arg2: memref<8xf32, #tpu.memory_space<smem>>, %arg3: memref<1x8x63x63xf32, #tpu.memory_space<vmem>>) attributes {dimension_semantics = [], scalar_prefetch = 0 : i64, scratch_operands = 0 : i64, tpu.core_type = #tpu.core_type<tc>} {
    %c0 = arith.constant 0 : index
    %c0_0 = arith.constant 0 : index
    %c0_1 = arith.constant 0 : index
    %c0_2 = arith.constant 0 : index
    %0 = vector.load %arg0[%c0, %c0_0, %c0_1, %c0_2] : memref<1x3x64x64xf32, #tpu.memory_space<vmem>>, vector<1x1x64x64xf32>
    %1 = vector.shape_cast %0 : vector<1x1x64x64xf32> to vector<64x64xf32>
    %c63_i32 = arith.constant 63 : i32
    %2 = tpu.dynamic_rotate %1 by %c63_i32 dim 1 : vector<64x64xf32>, i32 -> vector<64x64xf32>
    %c63_i32_3 = arith.constant 63 : i32
    %3 = tpu.dynamic_rotate %2 by %c63_i32_3 dim 0 : vector<64x64xf32>, i32 -> vector<64x64xf32>
    %c0_4 = arith.constant 0 : index
    %c1 = arith.constant 1 : index
    %c0_5 = arith.constant 0 : index
    %c0_6 = arith.constant 0 : index
    %4 = vector.load %arg0[%c0_4, %c1, %c0_5, %c0_6] : memref<1x3x64x64xf32, #tpu.memory_space<vmem>>, vector<1x1x64x64xf32>
    %5 = vector.shape_cast %4 : vector<1x1x64x64xf32> to vector<64x64xf32>
    %c63_i32_7 = arith.constant 63 : i32
    %6 = tpu.dynamic_rotate %5 by %c63_i32_7 dim 1 : vector<64x64xf32>, i32 -> vector<64x64xf32>
    %c63_i32_8 = arith.constant 63 : i32
    %7 = tpu.dynamic_rotate %6 by %c63_i32_8 dim 0 : vector<64x64xf32>, i32 -> vector<64x64xf32>
    %c0_9 = arith.constant 0 : index
    %c2 = arith.constant 2 : index
    %c0_10 = arith.constant 0 : index
    %c0_11 = arith.constant 0 : index
    %8 = vector.load %arg0[%c0_9, %c2, %c0_10, %c0_11] : memref<1x3x64x64xf32, #tpu.memory_space<vmem>>, vector<1x1x64x64xf32>
    %9 = vector.shape_cast %8 : vector<1x1x64x64xf32> to vector<64x64xf32>
    %c63_i32_12 = arith.constant 63 : i32
    %10 = tpu.dynamic_rotate %9 by %c63_i32_12 dim 1 : vector<64x64xf32>, i32 -> vector<64x64xf32>
    %c63_i32_13 = arith.constant 63 : i32
    %11 = tpu.dynamic_rotate %10 by %c63_i32_13 dim 0 : vector<64x64xf32>, i32 -> vector<64x64xf32>
    %c0_14 = arith.constant 0 : index
    %c0_15 = arith.constant 0 : index
    %12 = memref.load %arg1[%c0_14, %c0_15] : memref<3x8xf32, #tpu.memory_space<smem>>
    %13 = vector.broadcast %12 : f32 to vector<64x64xf32>
    %14 = arith.mulf %3, %13 : vector<64x64xf32>
    %c1_16 = arith.constant 1 : index
    %c0_17 = arith.constant 0 : index
    %15 = memref.load %arg1[%c1_16, %c0_17] : memref<3x8xf32, #tpu.memory_space<smem>>
    %16 = vector.broadcast %15 : f32 to vector<64x64xf32>
    %17 = arith.mulf %7, %16 : vector<64x64xf32>
    %18 = arith.addf %14, %17 : vector<64x64xf32>
    %c2_18 = arith.constant 2 : index
    %c0_19 = arith.constant 0 : index
    %19 = memref.load %arg1[%c2_18, %c0_19] : memref<3x8xf32, #tpu.memory_space<smem>>
    %20 = vector.broadcast %19 : f32 to vector<64x64xf32>
    %21 = arith.mulf %11, %20 : vector<64x64xf32>
    %22 = arith.addf %18, %21 : vector<64x64xf32>
    %c0_20 = arith.constant 0 : index
    %23 = memref.load %arg2[%c0_20] : memref<8xf32, #tpu.memory_space<smem>>
    %24 = vector.broadcast %23 : f32 to vector<64x64xf32>
    %25 = arith.addf %22, %24 : vector<64x64xf32>
    %cst = arith.constant 0.000000e+00 : f32
    %26 = vector.broadcast %cst : f32 to vector<64x64xf32>
    %27 = arith.maximumf %25, %26 : vector<64x64xf32>
    %28 = vector.extract_strided_slice %27 {offsets = [0, 0], sizes = [63, 63], strides = [1, 1]} : vector<64x64xf32> to vector<63x63xf32>
    %c0_21 = arith.constant 0 : index
    %c0_22 = arith.constant 0 : index
    %c0_23 = arith.constant 0 : index
    %c0_24 = arith.constant 0 : index
    %29 = vector.load %arg3[%c0_21, %c0_22, %c0_23, %c0_24] : memref<1x8x63x63xf32, #tpu.memory_space<vmem>>, vector<1x1x63x63xf32>
    %30 = vector.shape_cast %29 : vector<1x1x63x63xf32> to vector<63x63xf32>
    %31 = vector.shape_cast %28 : vector<63x63xf32> to vector<1x1x63x63xf32>
    tpu.vector_store %arg3[%c0_21, %c0_22, %c0_23, %c0_24], %31 {strides = array<i32>} : memref<1x8x63x63xf32, #tpu.memory_space<vmem>>, vector<1x1x63x63xf32>,
    %c0_25 = arith.constant 0 : index
    %c1_26 = arith.constant 1 : index
    %32 = memref.load %arg1[%c0_25, %c1_26] : memref<3x8xf32, #tpu.memory_space<smem>>
    %33 = vector.broadcast %32 : f32 to vector<64x64xf32>
    %34 = arith.mulf %3, %33 : vector<64x64xf32>
    %c1_27 = arith.constant 1 : index
    %c1_28 = arith.constant 1 : index
    %35 = memref.load %arg1[%c1_27, %c1_28] : memref<3x8xf32, #tpu.memory_space<smem>>
    %36 = vector.broadcast %35 : f32 to vector<64x64xf32>
    %37 = arith.mulf %7, %36 : vector<64x64xf32>
    %38 = arith.addf %34, %37 : vector<64x64xf32>
    %c2_29 = arith.constant 2 : index
    %c1_30 = arith.constant 1 : index
    %39 = memref.load %arg1[%c2_29, %c1_30] : memref<3x8xf32, #tpu.memory_space<smem>>
    %40 = vector.broadcast %39 : f32 to vector<64x64xf32>
    %41 = arith.mulf %11, %40 : vector<64x64xf32>
    %42 = arith.addf %38, %41 : vector<64x64xf32>
    %c1_31 = arith.constant 1 : index
    %43 = memref.load %arg2[%c1_31] : memref<8xf32, #tpu.memory_space<smem>>
    %44 = vector.broadcast %43 : f32 to vector<64x64xf32>
    %45 = arith.addf %42, %44 : vector<64x64xf32>
    %cst_32 = arith.constant 0.000000e+00 : f32
    %46 = vector.broadcast %cst_32 : f32 to vector<64x64xf32>
    %47 = arith.maximumf %45, %46 : vector<64x64xf32>
    %48 = vector.extract_strided_slice %47 {offsets = [0, 0], sizes = [63, 63], strides = [1, 1]} : vector<64x64xf32> to vector<63x63xf32>
    %c0_33 = arith.constant 0 : index
    %c1_34 = arith.constant 1 : index
    %c0_35 = arith.constant 0 : index
    %c0_36 = arith.constant 0 : index
    %49 = vector.load %arg3[%c0_33, %c1_34, %c0_35, %c0_36] : memref<1x8x63x63xf32, #tpu.memory_space<vmem>>, vector<1x1x63x63xf32>
    %50 = vector.shape_cast %49 : vector<1x1x63x63xf32> to vector<63x63xf32>
    %51 = vector.shape_cast %48 : vector<63x63xf32> to vector<1x1x63x63xf32>
    tpu.vector_store %arg3[%c0_33, %c1_34, %c0_35, %c0_36], %51 {strides = array<i32>} : memref<1x8x63x63xf32, #tpu.memory_space<vmem>>, vector<1x1x63x63xf32>,
    %c0_37 = arith.constant 0 : index
    %c2_38 = arith.constant 2 : index
    %52 = memref.load %arg1[%c0_37, %c2_38] : memref<3x8xf32, #tpu.memory_space<smem>>
    %53 = vector.broadcast %52 : f32 to vector<64x64xf32>
    %54 = arith.mulf %3, %53 : vector<64x64xf32>
    %c1_39 = arith.constant 1 : index
    %c2_40 = arith.constant 2 : index
    %55 = memref.load %arg1[%c1_39, %c2_40] : memref<3x8xf32, #tpu.memory_space<smem>>
    %56 = vector.broadcast %55 : f32 to vector<64x64xf32>
    %57 = arith.mulf %7, %56 : vector<64x64xf32>
    %58 = arith.addf %54, %57 : vector<64x64xf32>
    %c2_41 = arith.constant 2 : index
    %c2_42 = arith.constant 2 : index
    %59 = memref.load %arg1[%c2_41, %c2_42] : memref<3x8xf32, #tpu.memory_space<smem>>
    %60 = vector.broadcast %59 : f32 to vector<64x64xf32>
    %61 = arith.mulf %11, %60 : vector<64x64xf32>
    %62 = arith.addf %58, %61 : vector<64x64xf32>
    %c2_43 = arith.constant 2 : index
    %63 = memref.load %arg2[%c2_43] : memref<8xf32, #tpu.memory_space<smem>>
    %64 = vector.broadcast %63 : f32 to vector<64x64xf32>
    %65 = arith.addf %62, %64 : vector<64x64xf32>
    %cst_44 = arith.constant 0.000000e+00 : f32
    %66 = vector.broadcast %cst_44 : f32 to vector<64x64xf32>
    %67 = arith.maximumf %65, %66 : vector<64x64xf32>
    %68 = vector.extract_strided_slice %67 {offsets = [0, 0], sizes = [63, 63], strides = [1, 1]} : vector<64x64xf32> to vector<63x63xf32>
    %c0_45 = arith.constant 0 : index
    %c2_46 = arith.constant 2 : index
    %c0_47 = arith.constant 0 : index
    %c0_48 = arith.constant 0 : index
    %69 = vector.load %arg3[%c0_45, %c2_46, %c0_47, %c0_48] : memref<1x8x63x63xf32, #tpu.memory_space<vmem>>, vector<1x1x63x63xf32>
    %70 = vector.shape_cast %69 : vector<1x1x63x63xf32> to vector<63x63xf32>
    %71 = vector.shape_cast %68 : vector<63x63xf32> to vector<1x1x63x63xf32>
    tpu.vector_store %arg3[%c0_45, %c2_46, %c0_47, %c0_48], %71 {strides = array<i32>} : memref<1x8x63x63xf32, #tpu.memory_space<vmem>>, vector<1x1x63x63xf32>,
    %c0_49 = arith.constant 0 : index
    %c3 = arith.constant 3 : index
    %72 = memref.load %arg1[%c0_49, %c3] : memref<3x8xf32, #tpu.memory_space<smem>>
    %73 = vector.broadcast %72 : f32 to vector<64x64xf32>
    %74 = arith.mulf %3, %73 : vector<64x64xf32>
    %c1_50 = arith.constant 1 : index
    %c3_51 = arith.constant 3 : index
    %75 = memref.load %arg1[%c1_50, %c3_51] : memref<3x8xf32, #tpu.memory_space<smem>>
    %76 = vector.broadcast %75 : f32 to vector<64x64xf32>
    %77 = arith.mulf %7, %76 : vector<64x64xf32>
    %78 = arith.addf %74, %77 : vector<64x64xf32>
    %c2_52 = arith.constant 2 : index
    %c3_53 = arith.constant 3 : index
    %79 = memref.load %arg1[%c2_52, %c3_53] : memref<3x8xf32, #tpu.memory_space<smem>>
    %80 = vector.broadcast %79 : f32 to vector<64x64xf32>
    %81 = arith.mulf %11, %80 : vector<64x64xf32>
    %82 = arith.addf %78, %81 : vector<64x64xf32>
    %c3_54 = arith.constant 3 : index
    %83 = memref.load %arg2[%c3_54] : memref<8xf32, #tpu.memory_space<smem>>
    %84 = vector.broadcast %83 : f32 to vector<64x64xf32>
    %85 = arith.addf %82, %84 : vector<64x64xf32>
    %cst_55 = arith.constant 0.000000e+00 : f32
    %86 = vector.broadcast %cst_55 : f32 to vector<64x64xf32>
    %87 = arith.maximumf %85, %86 : vector<64x64xf32>
    %88 = vector.extract_strided_slice %87 {offsets = [0, 0], sizes = [63, 63], strides = [1, 1]} : vector<64x64xf32> to vector<63x63xf32>
    %c0_56 = arith.constant 0 : index
    %c3_57 = arith.constant 3 : index
    %c0_58 = arith.constant 0 : index
    %c0_59 = arith.constant 0 : index
    %89 = vector.load %arg3[%c0_56, %c3_57, %c0_58, %c0_59] : memref<1x8x63x63xf32, #tpu.memory_space<vmem>>, vector<1x1x63x63xf32>
    %90 = vector.shape_cast %89 : vector<1x1x63x63xf32> to vector<63x63xf32>
    %91 = vector.shape_cast %88 : vector<63x63xf32> to vector<1x1x63x63xf32>
    tpu.vector_store %arg3[%c0_56, %c3_57, %c0_58, %c0_59], %91 {strides = array<i32>} : memref<1x8x63x63xf32, #tpu.memory_space<vmem>>, vector<1x1x63x63xf32>,
    %c0_60 = arith.constant 0 : index
    %c4 = arith.constant 4 : index
    %92 = memref.load %arg1[%c0_60, %c4] : memref<3x8xf32, #tpu.memory_space<smem>>
    %93 = vector.broadcast %92 : f32 to vector<64x64xf32>
    %94 = arith.mulf %3, %93 : vector<64x64xf32>
    %c1_61 = arith.constant 1 : index
    %c4_62 = arith.constant 4 : index
    %95 = memref.load %arg1[%c1_61, %c4_62] : memref<3x8xf32, #tpu.memory_space<smem>>
    %96 = vector.broadcast %95 : f32 to vector<64x64xf32>
    %97 = arith.mulf %7, %96 : vector<64x64xf32>
    %98 = arith.addf %94, %97 : vector<64x64xf32>
    %c2_63 = arith.constant 2 : index
    %c4_64 = arith.constant 4 : index
    %99 = memref.load %arg1[%c2_63, %c4_64] : memref<3x8xf32, #tpu.memory_space<smem>>
    %100 = vector.broadcast %99 : f32 to vector<64x64xf32>
    %101 = arith.mulf %11, %100 : vector<64x64xf32>
    %102 = arith.addf %98, %101 : vector<64x64xf32>
    %c4_65 = arith.constant 4 : index
    %103 = memref.load %arg2[%c4_65] : memref<8xf32, #tpu.memory_space<smem>>
    %104 = vector.broadcast %103 : f32 to vector<64x64xf32>
    %105 = arith.addf %102, %104 : vector<64x64xf32>
    %cst_66 = arith.constant 0.000000e+00 : f32
    %106 = vector.broadcast %cst_66 : f32 to vector<64x64xf32>
    %107 = arith.maximumf %105, %106 : vector<64x64xf32>
    %108 = vector.extract_strided_slice %107 {offsets = [0, 0], sizes = [63, 63], strides = [1, 1]} : vector<64x64xf32> to vector<63x63xf32>
    %c0_67 = arith.constant 0 : index
    %c4_68 = arith.constant 4 : index
    %c0_69 = arith.constant 0 : index
    %c0_70 = arith.constant 0 : index
    %109 = vector.load %arg3[%c0_67, %c4_68, %c0_69, %c0_70] : memref<1x8x63x63xf32, #tpu.memory_space<vmem>>, vector<1x1x63x63xf32>
    %110 = vector.shape_cast %109 : vector<1x1x63x63xf32> to vector<63x63xf32>
    %111 = vector.shape_cast %108 : vector<63x63xf32> to vector<1x1x63x63xf32>
    tpu.vector_store %arg3[%c0_67, %c4_68, %c0_69, %c0_70], %111 {strides = array<i32>} : memref<1x8x63x63xf32, #tpu.memory_space<vmem>>, vector<1x1x63x63xf32>,
    %c0_71 = arith.constant 0 : index
    %c5 = arith.constant 5 : index
    %112 = memref.load %arg1[%c0_71, %c5] : memref<3x8xf32, #tpu.memory_space<smem>>
    %113 = vector.broadcast %112 : f32 to vector<64x64xf32>
    %114 = arith.mulf %3, %113 : vector<64x64xf32>
    %c1_72 = arith.constant 1 : index
    %c5_73 = arith.constant 5 : index
    %115 = memref.load %arg1[%c1_72, %c5_73] : memref<3x8xf32, #tpu.memory_space<smem>>
    %116 = vector.broadcast %115 : f32 to vector<64x64xf32>
    %117 = arith.mulf %7, %116 : vector<64x64xf32>
    %118 = arith.addf %114, %117 : vector<64x64xf32>
    %c2_74 = arith.constant 2 : index
    %c5_75 = arith.constant 5 : index
    %119 = memref.load %arg1[%c2_74, %c5_75] : memref<3x8xf32, #tpu.memory_space<smem>>
    %120 = vector.broadcast %119 : f32 to vector<64x64xf32>
    %121 = arith.mulf %11, %120 : vector<64x64xf32>
    %122 = arith.addf %118, %121 : vector<64x64xf32>
    %c5_76 = arith.constant 5 : index
    %123 = memref.load %arg2[%c5_76] : memref<8xf32, #tpu.memory_space<smem>>
    %124 = vector.broadcast %123 : f32 to vector<64x64xf32>
    %125 = arith.addf %122, %124 : vector<64x64xf32>
    %cst_77 = arith.constant 0.000000e+00 : f32
    %126 = vector.broadcast %cst_77 : f32 to vector<64x64xf32>
    %127 = arith.maximumf %125, %126 : vector<64x64xf32>
    %128 = vector.extract_strided_slice %127 {offsets = [0, 0], sizes = [63, 63], strides = [1, 1]} : vector<64x64xf32> to vector<63x63xf32>
    %c0_78 = arith.constant 0 : index
    %c5_79 = arith.constant 5 : index
    %c0_80 = arith.constant 0 : index
    %c0_81 = arith.constant 0 : index
    %129 = vector.load %arg3[%c0_78, %c5_79, %c0_80, %c0_81] : memref<1x8x63x63xf32, #tpu.memory_space<vmem>>, vector<1x1x63x63xf32>
    %130 = vector.shape_cast %129 : vector<1x1x63x63xf32> to vector<63x63xf32>
    %131 = vector.shape_cast %128 : vector<63x63xf32> to vector<1x1x63x63xf32>
    tpu.vector_store %arg3[%c0_78, %c5_79, %c0_80, %c0_81], %131 {strides = array<i32>} : memref<1x8x63x63xf32, #tpu.memory_space<vmem>>, vector<1x1x63x63xf32>,
    %c0_82 = arith.constant 0 : index
    %c6 = arith.constant 6 : index
    %132 = memref.load %arg1[%c0_82, %c6] : memref<3x8xf32, #tpu.memory_space<smem>>
    %133 = vector.broadcast %132 : f32 to vector<64x64xf32>
    %134 = arith.mulf %3, %133 : vector<64x64xf32>
    %c1_83 = arith.constant 1 : index
    %c6_84 = arith.constant 6 : index
    %135 = memref.load %arg1[%c1_83, %c6_84] : memref<3x8xf32, #tpu.memory_space<smem>>
    %136 = vector.broadcast %135 : f32 to vector<64x64xf32>
    %137 = arith.mulf %7, %136 : vector<64x64xf32>
    %138 = arith.addf %134, %137 : vector<64x64xf32>
    %c2_85 = arith.constant 2 : index
    %c6_86 = arith.constant 6 : index
    %139 = memref.load %arg1[%c2_85, %c6_86] : memref<3x8xf32, #tpu.memory_space<smem>>
    %140 = vector.broadcast %139 : f32 to vector<64x64xf32>
    %141 = arith.mulf %11, %140 : vector<64x64xf32>
    %142 = arith.addf %138, %141 : vector<64x64xf32>
    %c6_87 = arith.constant 6 : index
    %143 = memref.load %arg2[%c6_87] : memref<8xf32, #tpu.memory_space<smem>>
    %144 = vector.broadcast %143 : f32 to vector<64x64xf32>
    %145 = arith.addf %142, %144 : vector<64x64xf32>
    %cst_88 = arith.constant 0.000000e+00 : f32
    %146 = vector.broadcast %cst_88 : f32 to vector<64x64xf32>
    %147 = arith.maximumf %145, %146 : vector<64x64xf32>
    %148 = vector.extract_strided_slice %147 {offsets = [0, 0], sizes = [63, 63], strides = [1, 1]} : vector<64x64xf32> to vector<63x63xf32>
    %c0_89 = arith.constant 0 : index
    %c6_90 = arith.constant 6 : index
    %c0_91 = arith.constant 0 : index
    %c0_92 = arith.constant 0 : index
    %149 = vector.load %arg3[%c0_89, %c6_90, %c0_91, %c0_92] : memref<1x8x63x63xf32, #tpu.memory_space<vmem>>, vector<1x1x63x63xf32>
    %150 = vector.shape_cast %149 : vector<1x1x63x63xf32> to vector<63x63xf32>
    %151 = vector.shape_cast %148 : vector<63x63xf32> to vector<1x1x63x63xf32>
    tpu.vector_store %arg3[%c0_89, %c6_90, %c0_91, %c0_92], %151 {strides = array<i32>} : memref<1x8x63x63xf32, #tpu.memory_space<vmem>>, vector<1x1x63x63xf32>,
    %c0_93 = arith.constant 0 : index
    %c7 = arith.constant 7 : index
    %152 = memref.load %arg1[%c0_93, %c7] : memref<3x8xf32, #tpu.memory_space<smem>>
    %153 = vector.broadcast %152 : f32 to vector<64x64xf32>
    %154 = arith.mulf %3, %153 : vector<64x64xf32>
    %c1_94 = arith.constant 1 : index
    %c7_95 = arith.constant 7 : index
    %155 = memref.load %arg1[%c1_94, %c7_95] : memref<3x8xf32, #tpu.memory_space<smem>>
    %156 = vector.broadcast %155 : f32 to vector<64x64xf32>
    %157 = arith.mulf %7, %156 : vector<64x64xf32>
    %158 = arith.addf %154, %157 : vector<64x64xf32>
    %c2_96 = arith.constant 2 : index
    %c7_97 = arith.constant 7 : index
    %159 = memref.load %arg1[%c2_96, %c7_97] : memref<3x8xf32, #tpu.memory_space<smem>>
    %160 = vector.broadcast %159 : f32 to vector<64x64xf32>
    %161 = arith.mulf %11, %160 : vector<64x64xf32>
    %162 = arith.addf %158, %161 : vector<64x64xf32>
    %c7_98 = arith.constant 7 : index
    %163 = memref.load %arg2[%c7_98] : memref<8xf32, #tpu.memory_space<smem>>
    %164 = vector.broadcast %163 : f32 to vector<64x64xf32>
    %165 = arith.addf %162, %164 : vector<64x64xf32>
    %cst_99 = arith.constant 0.000000e+00 : f32
    %166 = vector.broadcast %cst_99 : f32 to vector<64x64xf32>
    %167 = arith.maximumf %165, %166 : vector<64x64xf32>
    %168 = vector.extract_strided_slice %167 {offsets = [0, 0], sizes = [63, 63], strides = [1, 1]} : vector<64x64xf32> to vector<63x63xf32>
    %c0_100 = arith.constant 0 : index
    %c7_101 = arith.constant 7 : index
    %c0_102 = arith.constant 0 : index
    %c0_103 = arith.constant 0 : index
    %169 = vector.load %arg3[%c0_100, %c7_101, %c0_102, %c0_103] : memref<1x8x63x63xf32, #tpu.memory_space<vmem>>, vector<1x1x63x63xf32>
    %170 = vector.shape_cast %169 : vector<1x1x63x63xf32> to vector<63x63xf32>
    %171 = vector.shape_cast %168 : vector<63x63xf32> to vector<1x1x63x63xf32>
    tpu.vector_store %arg3[%c0_100, %c7_101, %c0_102, %c0_103], %171 {strides = array<i32>} : memref<1x8x63x63xf32, #tpu.memory_space<vmem>>, vector<1x1x63x63xf32>,
    return
  }
}

</mosaic_0001>

<bundles_post_ra>
// kernel: tpu_custom_call.1
= control target key start
LH: loop header
LB: loop body
LE: loop exit
PB: predicated region body
PF: predicated region fallthrough
CT: control target
= control target key end

     0   :  { %s2594_s0 = inlined_call_operand.hbm [shape: f32[1,3,64,64], index: 0, kind: input, shape index: {}]   ;;  %s2595_s1 = inlined_call_operand.hbm [shape: f32[3,8], index: 1, kind: input, shape index: {}]   ;;  %s2596_s2 = inlined_call_operand.vmem [shape: f32[8], index: 2, kind: input, shape index: {}]   ;;  %s2597_s3 = inlined_call_operand.vmem [shape: f32[1,8,63,63], index: 3, kind: output, shape index: {}]  }
   0x1   :  { %2617 = sst [smem:[#allocation68_spill]] %s2597_s3 }
   0x2   :  { %8 = vsyncpa [#allocation3], 0 }
   0x3   :  { %9 = vsyncpa [#allocation4], 0 }
   0x4   :  { %10 = vsyncpa [#allocation5], 0  ;;  %s1104_s12 = smov [#allocation2]   ;;  %s1054_s16 = scalar_lea.hbm %s2594_s0, 3072 }
   0x5   :  { %s16_s13 = sshll.u32 %s1104_s12, 4  ;;  %p1055_p0 = scmp.ne.s32.totalorder %s2594_s0, %s1054_s16  ;;  %s17_s13 = int_to_ptr.vmem [resolvable:$true] %s16_s13 }
   0x6   :  { %p1058_p1 = scmp.lt.u32.totalorder %s1054_s16, %s2594_s0 }
   0x8   :  { %p1060_p2 = pnand %p1058_p1, %p1055_p0 }
   0xa   :  { %1063 = shalt.err (!%p1060_p2)
}
   0xb   :  { %s1064_s21 = scalar_lea.vmem %s17_s13, 3072  ;;  %p1069_p4 = scmp.lt.s32.totalorder %s17_s13, %s17_s13 }
   0xc   :  { %p1065_p3 = scmp.ne.s32.totalorder %s17_s13, %s1064_s21  ;;  %p1070_p5 = scmp.lt.s32.totalorder %s1064_s21, %s1064_s21 }
   0xe   :  { %p1071_p6 = por %p1070_p5, %p1069_p4 }
  0x10   :  { %p1072_p7 = pnand %p1071_p6, %p1065_p3 }
  0x12   :  { %1075 = shalt.err (!%p1072_p7)
}
  0x13   :  { %s1105_s22 = smov 128   ;;  %s1106_s23 = smov 8  }
  0x14   :  { %22 = dma.hbm_to_vmem [thread:$0]  %s2594_s0, 3072, %s17_s13, [#allocation3], %s1105_s22, %s1105_s22, %s1106_s23  }
  0x15   :  { %s1076_s28 = scalar_lea.hbm %s2595_s1, 64 }
  0x16   :  { %p1077_p8 = scmp.ne.s32.totalorder %s2595_s1, %s1076_s28  ;;  %p1080_p9 = scmp.lt.u32.totalorder %s1076_s28, %s2595_s1 }
  0x18   :  { %p1082_p10 = pnand %p1080_p9, %p1077_p8 }
  0x1a   :  { %1085 = shalt.err (!%p1082_p10)
}
  0x1b   :  { %s1107_s6 = smov [#allocation6]   ;;  %s37_s10 = sshll.u32 %s2596_s2, 4  ;;  %s38_s10 = int_to_ptr.vmem [resolvable:$true] %s37_s10 }
  0x1c   :  { %30 = dma.hbm_to_smem %s2595_s1, 64, %s1107_s6, [#allocation4]  }
  0x1d   :  { %s1086_s11 = scalar_lea.vmem %s38_s10, 16  ;;  %p1091_p12 = scmp.lt.s32.totalorder %s38_s10, %s38_s10 }
  0x1e   :  { %p1087_p11 = scmp.ne.s32.totalorder %s38_s10, %s1086_s11  ;;  %p1092_p13 = scmp.lt.s32.totalorder %s1086_s11, %s1086_s11 }
  0x20   :  { %p1093_p0 = por %p1092_p13, %p1091_p12 }
  0x22   :  { %p1094_p1 = pnand %p1093_p0, %p1087_p11 }
  0x24   :  { %1097 = shalt.err (!%p1094_p1)
}
  0x25   :  { %s1108_s12 = smov [#allocation7]  }
  0x26   :  { %40 = dma.vmem_to_smem %s38_s10, 16, %s1108_s12, [#allocation5]  }
  0x27   :  { %1098 = dma.done.wait [#allocation3], 3072  }
  0x28   :  { %1099 = vsyncadd [#allocation3], 4294964224 }
  0x29   :  { %1100 = dma.done.wait [#allocation4], 64  }
  0x2a   :  { %1101 = vsyncadd [#allocation4], 4294967232 }
  0x2b   :  { %1102 = dma.done.wait [#allocation5], 16  }
  0x2c   :  { %1103 = vsyncadd [#allocation5], 4294967280 }
  0x2d   :  { %50 = sfence }
  0x2e   :  { %v1158_v0 = vld [vmem:[#allocation2] sm:$0xff]  ;;  %v1160_v1 = vld [vmem:[#allocation2 + $0x10] sm:$0xff]  ;;  %s1109_s1 = smov 64   ;;  %v1166_v2 = vld [vmem:[#allocation2 + $0x8] sm:$0xff]  ;;  %vm59_vm0 = vcmask 1048064   ;;  %s1110_s2 = smov 127  }
  0x2f   :  { %60 = vrot.lane.b32.xlu0 %v1158_v0, %s1109_s1  ;;  %66 = vrot.lane.b32.xlu1 %v1160_v1, %s1109_s1  ;;  %v1168_v3 = vld [vmem:[#allocation2 + $0x18] sm:$0xff]  ;;  %v1174_v4 = vld [vmem:[#allocation2 + $0x20] sm:$0xff]  ;;  %v1176_v5 = vld [vmem:[#allocation2 + $0x28] sm:$0xff]  ;;  %s1398_s13 = sld [smem:[#allocation6]]  ;;  %s1400_s14 = sld [smem:[#allocation6 + $0x1]]  ;;  %vm433_vm2 = vcmask 515072  }
  0x30   :  { %v1182_v6 = vld [vmem:[#allocation2 + $0x30] sm:$0xff]  ;;  %v1184_v7 = vld [vmem:[#allocation2 + $0x38] sm:$0xff]  ;;  %v1190_v8 = vld [vmem:[#allocation2 + $0x40] sm:$0xff]  ;;  %s1402_s15 = sld [smem:[#allocation6 + $0x2]]  ;;  %s1404_s16 = sld [smem:[#allocation6 + $0x3]]  ;;  %vm441_vm3 = vcmask 514048  }
  0x31   :  { %v1192_v9 = vld [vmem:[#allocation2 + $0x48] sm:$0xff]  ;;  %v1198_v10 = vld [vmem:[#allocation2 + $0x50] sm:$0xff]  ;;  %v1200_v11 = vld [vmem:[#allocation2 + $0x58] sm:$0xff]  ;;  %s1406_s17 = sld [smem:[#allocation6 + $0x4]]  ;;  %s1408_s18 = sld [smem:[#allocation6 + $0x5]] }
  0x32   :  { %v1206_v12 = vld [vmem:[#allocation2 + $0x60] sm:$0xff]  ;;  %v1208_v13 = vld [vmem:[#allocation2 + $0x68] sm:$0xff]  ;;  %v1214_v14 = vld [vmem:[#allocation2 + $0x70] sm:$0xff]  ;;  %s1410_s19 = sld [smem:[#allocation6 + $0x6]]  ;;  %s1412_s20 = sld [smem:[#allocation6 + $0x7]] }
  0x33   :  { %63 = vrot.lane.b32.xlu0 %v1166_v2, %s1109_s1  ;;  %69 = vrot.lane.b32.xlu1 %v1168_v3, %s1109_s1  ;;  %v1216_v15 = vld [vmem:[#allocation2 + $0x78] sm:$0xff]  ;;  %v1222_v16 = vld [vmem:[#allocation2 + $0x80] sm:$0xff]  ;;  %v1224_v17 = vld [vmem:[#allocation2 + $0x88] sm:$0xff]  ;;  %s1414_s21 = sld [smem:[#allocation6 + $0x80]]  ;;  %s1416_s22 = sld [smem:[#allocation6 + $0x81]] }
  0x34   :  { %v1230_v18 = vld [vmem:[#allocation2 + $0x90] sm:$0xff]  ;;  %v1232_v19 = vld [vmem:[#allocation2 + $0x98] sm:$0xff]  ;;  %v1238_v20 = vld [vmem:[#allocation2 + $0xa0] sm:$0xff]  ;;  %s1418_s23 = sld [smem:[#allocation6 + $0x82]]  ;;  %s1420_s24 = sld [smem:[#allocation6 + $0x83]] }
  0x35   :  { %v1240_v21 = vld [vmem:[#allocation2 + $0xa8] sm:$0xff]  ;;  %v1246_v22 = vld [vmem:[#allocation2 + $0xb0] sm:$0xff]  ;;  %v1248_v23 = vld [vmem:[#allocation2 + $0xb8] sm:$0xff]  ;;  %s1422_s25 = sld [smem:[#allocation6 + $0x84]]  ;;  %s1424_s26 = sld [smem:[#allocation6 + $0x85]] }
  0x36   :  { %s1426_s27 = sld [smem:[#allocation6 + $0x86]]  ;;  %s1428_s28 = sld [smem:[#allocation6 + $0x87]] }
  0x37   :  { %72 = vrot.lane.b32.xlu0 %v1174_v4, %s1109_s1  ;;  %75 = vrot.lane.b32.xlu1 %v1176_v5, %s1109_s1  ;;  %s1430_s29 = sld [smem:[#allocation6 + $0x100]]  ;;  %s1432_s30 = sld [smem:[#allocation6 + $0x101]] }
  0x38   :  { %s1434_s4 = sld [smem:[#allocation6 + $0x102]]  ;;  %s1438_s5 = sld [smem:[#allocation6 + $0x103]] }
  0x39   :  { %s1440_s6 = sld [smem:[#allocation6 + $0x104]]  ;;  %s1442_s7 = sld [smem:[#allocation6 + $0x105]] }
  0x3a   :  { %s1444_s8 = sld [smem:[#allocation6 + $0x106]]  ;;  %s1446_s0 = sld [smem:[#allocation7]] }
  0x3b   :  { %78 = vrot.lane.b32.xlu0 %v1182_v6, %s1109_s1  ;;  %81 = vrot.lane.b32.xlu1 %v1184_v7, %s1109_s1  ;;  %s1448_s9 = sld [smem:[#allocation6 + $0x107]]  ;;  %s1450_s10 = sld [smem:[#allocation7 + $0x1]] }
  0x3c   :  { %s1452_s11 = sld [smem:[#allocation7 + $0x2]]  ;;  %s1457_s12 = sld [smem:[#allocation7 + $0x3]] }
  0x3d   :  { %s1475_s3 = sld [smem:[#allocation7 + $0x6]] }
  0x3f   :  { %168 = vrot.lane.b32.xlu0 %v1190_v8, %s1109_s1  ;;  %171 = vrot.lane.b32.xlu1 %v1192_v9, %s1109_s1 }
  0x43   :  { %174 = vrot.lane.b32.xlu0 %v1198_v10, %s1109_s1  ;;  %177 = vrot.lane.b32.xlu1 %v1200_v11, %s1109_s1 }
  0x47   :  { %180 = vrot.lane.b32.xlu0 %v1206_v12, %s1109_s1  ;;  %183 = vrot.lane.b32.xlu1 %v1208_v13, %s1109_s1 }
  0x4b   :  { %186 = vrot.lane.b32.xlu0 %v1214_v14, %s1109_s1  ;;  %189 = vrot.lane.b32.xlu1 %v1216_v15, %s1109_s1 }
  0x4f   :  { %273 = vrot.lane.b32.xlu0 %v1222_v16, %s1109_s1  ;;  %276 = vrot.lane.b32.xlu1 %v1224_v17, %s1109_s1 }
  0x53   :  { %279 = vrot.lane.b32.xlu0 %v1230_v18, %s1109_s1  ;;  %282 = vrot.lane.b32.xlu1 %v1232_v19, %s1109_s1 }
  0x57   :  { %285 = vrot.lane.b32.xlu0 %v1238_v20, %s1109_s1  ;;  %288 = vrot.lane.b32.xlu1 %v1240_v21, %s1109_s1 }
  0x5b   :  { %291 = vrot.lane.b32.xlu0 %v1246_v22, %s1109_s1  ;;  %294 = vrot.lane.b32.xlu1 %v1248_v23, %s1109_s1 }
  0xa1   :  { %v61_v24 = vpop.permute.xlu0 %60  ;;  %v67_v25 = vpop.permute.xlu1 %66 }
  0xa2   :  { %v62_v26 = vsel %vm59_vm0, %v61_v24, %v1158_v0  ;;  %v68_v27 = vsel %vm59_vm0, %v67_v25, %v1160_v1 }
  0xa3   :  { %84 = vrot.lane.b32.xlu0 %v62_v26, %s1109_s1 }
  0xa5   :  { %v64_v28 = vpop.permute.xlu0 %63  ;;  %v70_v29 = vpop.permute.xlu1 %69 }
  0xa6   :  { %v65_v30 = vsel %vm59_vm0, %v64_v28, %v1166_v2  ;;  %v71_v31 = vsel %vm59_vm0, %v70_v29, %v1168_v3 }
  0xa7   :  { %88 = vrot.lane.b32.xlu0 %v68_v27, %s1109_s1  ;;  %86 = vrot.lane.b32.xlu1 %v65_v30, %s1109_s1 }
  0xa9   :  { %v73_v32 = vpop.permute.xlu0 %72  ;;  %v76_v33 = vpop.permute.xlu1 %75 }
  0xaa   :  { %v74_v34 = vsel %vm59_vm0, %v73_v32, %v1174_v4  ;;  %v77_v35 = vsel %vm59_vm0, %v76_v33, %v1176_v5 }
  0xab   :  { %90 = vrot.lane.b32.xlu1 %v71_v31, %s1109_s1  ;;  %92 = vrot.lane.b32.xlu0 %v74_v34, %s1109_s1 }
  0xad   :  { %v79_v36 = vpop.permute.xlu0 %78  ;;  %v82_v37 = vpop.permute.xlu1 %81 }
  0xae   :  { %v80_v38 = vsel %vm59_vm0, %v79_v36, %v1182_v6  ;;  %v83_v39 = vsel %vm59_vm0, %v82_v37, %v1184_v7 }
  0xaf   :  { %94 = vrot.lane.b32.xlu1 %v77_v35, %s1109_s1  ;;  %96 = vrot.lane.b32.xlu0 %v80_v38, %s1109_s1 }
  0xb1   :  { %v169_v40 = vpop.permute.xlu0 %168  ;;  %v172_v41 = vpop.permute.xlu1 %171 }
  0xb2   :  { %v170_v42 = vsel %vm59_vm0, %v169_v40, %v1190_v8  ;;  %v173_v43 = vsel %vm59_vm0, %v172_v41, %v1192_v9 }
  0xb3   :  { %98 = vrot.lane.b32.xlu1 %v83_v39, %s1109_s1  ;;  %192 = vrot.lane.b32.xlu0 %v170_v42, %s1109_s1 }
  0xb5   :  { %v175_v44 = vpop.permute.xlu0 %174  ;;  %v178_v45 = vpop.permute.xlu1 %177 }
  0xb6   :  { %v176_v46 = vsel %vm59_vm0, %v175_v44, %v1198_v10  ;;  %v179_v47 = vsel %vm59_vm0, %v178_v45, %v1200_v11 }
  0xb7   :  { %194 = vrot.lane.b32.xlu1 %v173_v43, %s1109_s1  ;;  %196 = vrot.lane.b32.xlu0 %v176_v46, %s1109_s1 }
  0xb9   :  { %v181_v48 = vpop.permute.xlu0 %180  ;;  %v184_v49 = vpop.permute.xlu1 %183 }
  0xba   :  { %v182_v50 = vsel %vm59_vm0, %v181_v48, %v1206_v12  ;;  %v185_v51 = vsel %vm59_vm0, %v184_v49, %v1208_v13 }
  0xbb   :  { %198 = vrot.lane.b32.xlu1 %v179_v47, %s1109_s1  ;;  %200 = vrot.lane.b32.xlu0 %v182_v50, %s1109_s1 }
  0xbd   :  { %v187_v52 = vpop.permute.xlu0 %186  ;;  %v190_v53 = vpop.permute.xlu1 %189 }
  0xbe   :  { %v188_v54 = vsel %vm59_vm0, %v187_v52, %v1214_v14  ;;  %v191_v55 = vsel %vm59_vm0, %v190_v53, %v1216_v15 }
  0xbf   :  { %202 = vrot.lane.b32.xlu1 %v185_v51, %s1109_s1  ;;  %204 = vrot.lane.b32.xlu0 %v188_v54, %s1109_s1 }
  0xc1   :  { %v274_v56 = vpop.permute.xlu0 %273  ;;  %v277_v57 = vpop.permute.xlu1 %276 }
  0xc2   :  { %v275_v58 = vsel %vm59_vm0, %v274_v56, %v1222_v16  ;;  %v278_v59 = vsel %vm59_vm0, %v277_v57, %v1224_v17 }
  0xc3   :  { %206 = vrot.lane.b32.xlu1 %v191_v55, %s1109_s1  ;;  %297 = vrot.lane.b32.xlu0 %v275_v58, %s1109_s1 }
  0xc5   :  { %v280_v60 = vpop.permute.xlu0 %279  ;;  %v283_v61 = vpop.permute.xlu1 %282 }
  0xc6   :  { %v281_v62 = vsel %vm59_vm0, %v280_v60, %v1230_v18  ;;  %v284_v63 = vsel %vm59_vm0, %v283_v61, %v1232_v19  ;;  %v1465_v60 = vstv %s1400_s14  ;;  %v1468_v61 = vstv %s1402_s15  ;;  %s2754_s15 = sld [smem:[#allocation68_spill]] }
  0xc7   :  { %299 = vrot.lane.b32.xlu1 %v278_v59, %s1109_s1  ;;  %301 = vrot.lane.b32.xlu0 %v281_v62, %s1109_s1  ;;  %v1462_v59 = vstv %s1398_s13  ;;  %v1471_v62 = vstv %s1404_s16  ;;  %s1489_s13 = sld [smem:[#allocation7 + $0x7]] }
  0xc9   :  { %v286_v24 = vpop.permute.xlu0 %285  ;;  %v289_v25 = vpop.permute.xlu1 %288 }
  0xca   :  { %v287_v26 = vsel %vm59_vm0, %v286_v24, %v1238_v20  ;;  %v290_v27 = vsel %vm59_vm0, %v289_v25, %v1240_v21  ;;  %v1481_v24 = vstv %s1408_s18  ;;  %v1484_v25 = vstv %s1410_s19 }
  0xcb   :  { %303 = vrot.lane.b32.xlu1 %v284_v63, %s1109_s1  ;;  %305 = vrot.lane.b32.xlu0 %v287_v26, %s1109_s1  ;;  %v1478_v63 = vstv %s1406_s17  ;;  %v1487_v26 = vstv %s1412_s20 }
  0xcd   :  { %v292_v28 = vpop.permute.xlu0 %291  ;;  %v295_v29 = vpop.permute.xlu1 %294 }
  0xce   :  { %v293_v30 = vsel %vm59_vm0, %v292_v28, %v1246_v22  ;;  %v296_v31 = vsel %vm59_vm0, %v295_v29, %v1248_v23  ;;  %v1495_v28 = vstv %s1416_s22  ;;  %v1498_v29 = vstv %s1418_s23 }
  0xcf   :  { %307 = vrot.lane.b32.xlu1 %v290_v27, %s1109_s1  ;;  %309 = vrot.lane.b32.xlu0 %v293_v30, %s1109_s1  ;;  %v1492_v27 = vstv %s1414_s21  ;;  %v1501_v30 = vstv %s1420_s24 }
  0xd3   :  { %311 = vrot.lane.b32.xlu1 %v296_v31, %s1109_s1  ;;  %s1459_s1 = sld [smem:[#allocation7 + $0x4]] }
 0x115   :  { %v85_v32 = vpop.permute.xlu0 %84 }
 0x116   :  { %v100_v33 = vsel %vm59_vm0, %v85_v32, %v1158_v0 }
 0x117   :  { %116 = vrot.lane.b32.xlu0 %v100_v33, %s1110_s2  ;;  %v1504_v33 = vstv %s1422_s25 }
 0x119   :  { %v87_v34 = vpop.permute.xlu1 %86  ;;  %v89_v35 = vpop.permute.xlu0 %88 }
 0x11a   :  { %v101_v36 = vsel %vm59_vm0, %v87_v34, %v1166_v2  ;;  %v102_v37 = vsel %vm59_vm0, %v89_v35, %v1160_v1  ;;  %v1507_v34 = vstv %s1424_s26  ;;  %v1510_v35 = vstv %s1426_s27 }
 0x11b   :  { %118 = vrot.lane.b32.xlu1 %v101_v36, %s1110_s2  ;;  %120 = vrot.lane.b32.xlu0 %v102_v37, %s1110_s2  ;;  %v1513_v36 = vstv %s1428_s28 }
 0x11d   :  { %v91_v38 = vpop.permute.xlu1 %90  ;;  %v93_v39 = vpop.permute.xlu0 %92 }
 0x11e   :  { %v103_v0 = vsel %vm59_vm0, %v91_v38, %v1168_v3  ;;  %v104_v40 = vsel %vm59_vm0, %v93_v39, %v1174_v4 }
 0x11f   :  { %122 = vrot.lane.b32.xlu1 %v103_v0, %s1110_s2  ;;  %124 = vrot.lane.b32.xlu0 %v104_v40, %s1110_s2  ;;  %v1517_v0 = vstv %s1430_s29  ;;  %v1520_v40 = vstv %s1432_s30 }
 0x120   :  { %2618 = vst [vmem:[#allocation11_spill] sm:$0xff] %v1517_v0  ;;  %2619 = vst [vmem:[#allocation12_spill] sm:$0xff] %v1520_v40 }
 0x121   :  { %v95_v2 = vpop.permute.xlu1 %94  ;;  %v97_v41 = vpop.permute.xlu0 %96 }
 0x122   :  { %v105_v1 = vsel %vm59_vm0, %v95_v2, %v1176_v5  ;;  %v106_v42 = vsel %vm59_vm0, %v97_v41, %v1182_v6  ;;  %v1523_v2 = vstv %s1434_s4  ;;  %v1526_v41 = vstv %s1438_s5 }
 0x123   :  { %126 = vrot.lane.b32.xlu1 %v105_v1, %s1110_s2  ;;  %128 = vrot.lane.b32.xlu0 %v106_v42, %s1110_s2  ;;  %2620 = vst [vmem:[#allocation13_spill] sm:$0xff] %v1523_v2  ;;  %2621 = vst [vmem:[#allocation14_spill] sm:$0xff] %v1526_v41  ;;  %v1529_v1 = vstv %s1440_s6 }
 0x124   :  { %2622 = vst [vmem:[#allocation15_spill] sm:$0xff] %v1529_v1 }
 0x125   :  { %v99_v3 = vpop.permute.xlu1 %98  ;;  %v193_v43 = vpop.permute.xlu0 %192 }
 0x126   :  { %v107_v4 = vsel %vm59_vm0, %v99_v3, %v1184_v7  ;;  %v208_v44 = vsel %vm59_vm0, %v193_v43, %v1190_v8  ;;  %v1536_v3 = vstv %s1442_s7  ;;  %v1539_v43 = vstv %s1444_s8 }
 0x127   :  { %130 = vrot.lane.b32.xlu1 %v107_v4, %s1110_s2  ;;  %224 = vrot.lane.b32.xlu0 %v208_v44, %s1110_s2  ;;  %2623 = vst [vmem:[#allocation16_spill] sm:$0xff] %v1536_v3  ;;  %2624 = vst [vmem:[#allocation17_spill] sm:$0xff] %v1539_v43  ;;  %v1542_v4 = vstv %s1448_s9 }
 0x128   :  { %2625 = vst [vmem:[#allocation18_spill] sm:$0xff] %v1542_v4 }
 0x129   :  { %v195_v5 = vpop.permute.xlu1 %194  ;;  %v197_v45 = vpop.permute.xlu0 %196 }
 0x12a   :  { %v209_v6 = vsel %vm59_vm0, %v195_v5, %v1192_v9  ;;  %v210_v46 = vsel %vm59_vm0, %v197_v45, %v1198_v10  ;;  %v1545_v45 = vstv %s1446_s0 }
 0x12b   :  { %226 = vrot.lane.b32.xlu1 %v209_v6, %s1110_s2  ;;  %228 = vrot.lane.b32.xlu0 %v210_v46, %s1110_s2  ;;  %2626 = vst [vmem:[#allocation19_spill] sm:$0xff] %v1545_v45  ;;  %v1548_v6 = vstv %s1450_s10  ;;  %v1551_v46 = vstv %s1452_s11 }
 0x12c   :  { %2627 = vst [vmem:[#allocation20_spill] sm:$0xff] %v1548_v6  ;;  %2628 = vst [vmem:[#allocation21_spill] sm:$0xff] %v1551_v46 }
 0x12d   :  { %v199_v7 = vpop.permute.xlu1 %198  ;;  %v201_v47 = vpop.permute.xlu0 %200 }
 0x12e   :  { %v211_v8 = vsel %vm59_vm0, %v199_v7, %v1200_v11  ;;  %v212_v48 = vsel %vm59_vm0, %v201_v47, %v1206_v12  ;;  %v1554_v7 = vstv %s1457_s12 }
 0x12f   :  { %230 = vrot.lane.b32.xlu1 %v211_v8, %s1110_s2  ;;  %232 = vrot.lane.b32.xlu0 %v212_v48, %s1110_s2  ;;  %2629 = vst [vmem:[#allocation22_spill] sm:$0xff] %v1554_v7  ;;  %v1559_v8 = vstv %s1459_s1 }
 0x130   :  { %2630 = vst [vmem:[#allocation23_spill] sm:$0xff] %v1559_v8 }
 0x131   :  { %v203_v9 = vpop.permute.xlu1 %202  ;;  %v205_v49 = vpop.permute.xlu0 %204 }
 0x132   :  { %v213_v10 = vsel %vm59_vm0, %v203_v9, %v1208_v13  ;;  %v214_v50 = vsel %vm59_vm0, %v205_v49, %v1214_v14  ;;  %v1565_v9 = vstv %s1475_s3 }
 0x133   :  { %234 = vrot.lane.b32.xlu1 %v213_v10, %s1110_s2  ;;  %236 = vrot.lane.b32.xlu0 %v214_v50, %s1110_s2  ;;  %2632 = vst [vmem:[#allocation25_spill] sm:$0xff] %v1565_v9 }
 0x135   :  { %v207_v11 = vpop.permute.xlu1 %206  ;;  %v298_v51 = vpop.permute.xlu0 %297 }
 0x136   :  { %v215_v12 = vsel %vm59_vm0, %v207_v11, %v1216_v15  ;;  %v313_v52 = vsel %vm59_vm0, %v298_v51, %v1222_v16  ;;  %v1577_v11 = vstv %s1489_s13 }
 0x137   :  { %238 = vrot.lane.b32.xlu1 %v215_v12, %s1110_s2  ;;  %329 = vrot.lane.b32.xlu0 %v313_v52, %s1110_s2  ;;  %2633 = vst [vmem:[#allocation26_spill] sm:$0xff] %v1577_v11 }
 0x139   :  { %v300_v13 = vpop.permute.xlu1 %299  ;;  %v302_v53 = vpop.permute.xlu0 %301 }
 0x13a   :  { %v314_v14 = vsel %vm59_vm0, %v300_v13, %v1224_v17  ;;  %v315_v54 = vsel %vm59_vm0, %v302_v53, %v1230_v18 }
 0x13b   :  { %331 = vrot.lane.b32.xlu1 %v314_v14, %s1110_s2  ;;  %333 = vrot.lane.b32.xlu0 %v315_v54, %s1110_s2 }
 0x13d   :  { %v304_v15 = vpop.permute.xlu1 %303  ;;  %v306_v55 = vpop.permute.xlu0 %305 }
 0x13e   :  { %v316_v16 = vsel %vm59_vm0, %v304_v15, %v1232_v19  ;;  %v317_v56 = vsel %vm59_vm0, %v306_v55, %v1238_v20 }
 0x13f   :  { %335 = vrot.lane.b32.xlu1 %v316_v16, %s1110_s2  ;;  %337 = vrot.lane.b32.xlu0 %v317_v56, %s1110_s2 }
 0x141   :  { %v308_v17 = vpop.permute.xlu1 %307  ;;  %v310_v57 = vpop.permute.xlu0 %309 }
 0x142   :  { %v318_v18 = vsel %vm59_vm0, %v308_v17, %v1240_v21  ;;  %v319_v58 = vsel %vm59_vm0, %v310_v57, %v1246_v22  ;;  %v148_v21 = vlaneseq }
 0x143   :  { %339 = vrot.lane.b32.xlu1 %v318_v18, %s1110_s2  ;;  %341 = vrot.lane.b32.xlu0 %v319_v58, %s1110_s2 }
 0x144   :  { %v1436_v22 = vshrl.u32 %v148_v21, 7 }
 0x145   :  { %v312_v19 = vpop.permute.xlu1 %311 }
 0x146   :  { %v320_v20 = vsel %vm59_vm0, %v312_v19, %v1248_v23  ;;  %vm150_vm1 = vcmp.lt.s32.totalorder %v1436_v22, 7 }
 0x147   :  { %343 = vrot.lane.b32.xlu1 %v320_v20, %s1110_s2  ;;  %s1473_s2 = sld [smem:[#allocation7 + $0x5]] }
 0x14d   :  { %v1562_v48 = vstv %s1473_s2 }
 0x14e   :  { %2631 = vst [vmem:[#allocation24_spill] sm:$0xff] %v1562_v48 }
 0x189   :  { %v1454_v23 = vpop.permute.xlu0 %116 }
 0x18a   :  { %v2599_v37 = vrot.slane %v1454_v23, 1 }
 0x18d   :  { %v119_v31 = vpop.permute.xlu1 %118  ;;  %v121_v32 = vpop.permute.xlu0 %120 }
 0x18e   :  { %v141_v38 = vrot.slane %v119_v31, 1  ;;  %v142_v39 = vrot.slane %v121_v32, 1 }
 0x190   :  { %v157_v42 = vsel %vm150_vm1, %v2599_v37, %v141_v38  ;;  %v156_v47 = vsel %vm150_vm1, %v141_v38, %v142_v39 }
 0x191   :  { %v123_v44 = vpop.permute.xlu1 %122  ;;  %v125_v5 = vpop.permute.xlu0 %124  ;;  %v1568_v49 = vmul.f32 %v1462_v59, %v157_v42  ;;  %v1571_v10 = vmul.f32 %v1465_v60, %v157_v42  ;;  %v1574_v50 = vmul.f32 %v1468_v61, %v157_v42  ;;  %v1580_v51 = vmul.f32 %v1471_v62, %v157_v42 }
 0x192   :  { %v1583_v12 = vmul.f32 %v1478_v63, %v157_v42  ;;  %v1586_v52 = vmul.f32 %v1481_v24, %v157_v42  ;;  %v1589_v13 = vmul.f32 %v1484_v25, %v157_v42  ;;  %v1592_v53 = vmul.f32 %v1487_v26, %v157_v42 }
 0x193   :  { %v1595_v14 = vmul.f32 %v1462_v59, %v156_v47  ;;  %v143_v54 = vrot.slane %v123_v44, 1  ;;  %v144_v15 = vrot.slane %v125_v5, 1  ;;  %v1598_v56 = vmul.f32 %v1465_v60, %v156_v47 }
 0x194   :  { %v1601_v17 = vmul.f32 %v1468_v61, %v156_v47  ;;  %v1604_v57 = vmul.f32 %v1471_v62, %v156_v47  ;;  %v1607_v18 = vmul.f32 %v1478_v63, %v156_v47  ;;  %v1610_v58 = vmul.f32 %v1481_v24, %v156_v47 }
 0x195   :  { %v127_v55 = vpop.permute.xlu1 %126  ;;  %v129_v16 = vpop.permute.xlu0 %128  ;;  %v1613_v19 = vmul.f32 %v1484_v25, %v156_v47  ;;  %v155_v20 = vsel %vm150_vm1, %v142_v39, %v143_v54  ;;  %v154_v21 = vsel %vm150_vm1, %v143_v54, %v144_v15  ;;  %v1620_v31 = vmul.f32 %v1487_v26, %v156_v47 }
 0x196   :  { %v1623_v32 = vmul.f32 %v1462_v59, %v155_v20  ;;  %v145_v38 = vrot.slane %v127_v55, 1  ;;  %v146_v42 = vrot.slane %v129_v16, 1  ;;  %v1626_v44 = vmul.f32 %v1465_v60, %v155_v20 }
 0x197   :  { %v1629_v5 = vmul.f32 %v1468_v61, %v155_v20  ;;  %v1632_v37 = vmul.f32 %v1471_v62, %v155_v20  ;;  %v1635_v39 = vmul.f32 %v1478_v63, %v155_v20  ;;  %v1640_v11 = vmul.f32 %v1481_v24, %v155_v20 }
 0x198   :  { %v1643_v55 = vmul.f32 %v1484_v25, %v155_v20  ;;  %v1646_v16 = vmul.f32 %v1487_v26, %v155_v20  ;;  %v1649_v9 = vmul.f32 %v1462_v59, %v154_v21  ;;  %v1652_v48 = vmul.f32 %v1465_v60, %v154_v21 }
 0x199   :  { %v131_v54 = vpop.permute.xlu1 %130  ;;  %v1637_v47 = vpop.permute.xlu0 %224  ;;  %v1655_v8 = vmul.f32 %v1468_v61, %v154_v21  ;;  %v1658_v7 = vmul.f32 %v1471_v62, %v154_v21  ;;  %v1661_v46 = vmul.f32 %v1478_v63, %v154_v21  ;;  %v1664_v6 = vmul.f32 %v1481_v24, %v154_v21 }
 0x19a   :  { %v1667_v20 = vmul.f32 %v1484_v25, %v154_v21  ;;  %v153_v45 = vsel %vm150_vm1, %v144_v15, %v145_v38  ;;  %v152_v4 = vsel %vm150_vm1, %v145_v38, %v146_v42  ;;  %v1674_v43 = vmul.f32 %v1487_v26, %v154_v21 }
 0x19b   :  { %v1677_v3 = vmul.f32 %v1462_v59, %v153_v45  ;;  %v147_v1 = vrot.slane %v131_v54, 1  ;;  %v1681_v2 = vmul.f32 %v1465_v60, %v153_v45  ;;  %v1684_v40 = vmul.f32 %v1468_v61, %v153_v45 }
 0x19c   :  { %2634 = vst [vmem:[#allocation27_spill] sm:$0xff] %v1674_v43  ;;  %v1687_v15 = vmul.f32 %v1471_v62, %v153_v45  ;;  %v1690_v38 = vmul.f32 %v1478_v63, %v153_v45  ;;  %v1693_v21 = vmul.f32 %v1481_v24, %v153_v45  ;;  %v1696_v0 = vmul.f32 %v1484_v25, %v153_v45 }
 0x19d   :  { %2635 = vst [vmem:[#allocation28_spill] sm:$0xff] %v1677_v3  ;;  %2636 = vst [vmem:[#allocation29_spill] sm:$0xff] %v1681_v2  ;;  %v1699_v54 = vmul.f32 %v1487_v26, %v153_v45  ;;  %v1702_v41 = vmul.f32 %v1462_v59, %v152_v4  ;;  %v227_v2 = vpop.permute.xlu1 %226  ;;  %v1719_v45 = vmul.f32 %v1481_v24, %v152_v4 }
 0x19e   :  { %2637 = vst [vmem:[#allocation30_spill] sm:$0xff] %v1684_v40  ;;  %2638 = vst [vmem:[#allocation31_spill] sm:$0xff] %v1687_v15  ;;  %v1704_v40 = vpop.permute.xlu0 %228  ;;  %v1707_v15 = vmul.f32 %v1465_v60, %v152_v4  ;;  %v1731_v3 = vmul.f32 %v1487_v26, %v152_v4 }
 0x19f   :  { %2639 = vst [vmem:[#allocation32_spill] sm:$0xff] %v1690_v38  ;;  %2640 = vst [vmem:[#allocation33_spill] sm:$0xff] %v1693_v21  ;;  %v1710_v38 = vmul.f32 %v1468_v61, %v152_v4  ;;  %v1713_v21 = vmul.f32 %v1471_v62, %v152_v4 }
 0x1a0   :  { %2641 = vst [vmem:[#allocation34_spill] sm:$0xff] %v1696_v0  ;;  %2642 = vst [vmem:[#allocation35_spill] sm:$0xff] %v1699_v54  ;;  %v1716_v0 = vmul.f32 %v1478_v63, %v152_v4  ;;  %v151_v54 = vsel %vm150_vm1, %v146_v42, %v147_v1 }
 0x1a1   :  { %2643 = vst [vmem:[#allocation36_spill] sm:$0xff] %v1702_v41  ;;  %2644 = vst [vmem:[#allocation37_spill] sm:$0xff] %v1707_v15  ;;  %v1722_v41 = vmul.f32 %v1484_v25, %v152_v4  ;;  %v2650_v15 = vrot.slane %v1454_v23, 1  ;;  %v1753_v42 = vmul.f32 %v1471_v62, %v151_v54 }
 0x1a2   :  { %2645 = vst [vmem:[#allocation38_spill] sm:$0xff] %v1710_v38  ;;  %2646 = vst [vmem:[#allocation39_spill] sm:$0xff] %v1713_v21  ;;  %v1734_v21 = vmul.f32 %v1462_v59, %v151_v54 }
 0x1a3   :  { %2647 = vst [vmem:[#allocation40_spill] sm:$0xff] %v1716_v0  ;;  %2648 = vst [vmem:[#allocation41_spill] sm:$0xff] %v1719_v45  ;;  %v158_v38 = vsel %vm150_vm1, %v147_v1, %v2650_v15  ;;  %v249_v0 = vrot.slane %v227_v2, 1  ;;  %v250_v45 = vrot.slane %v1704_v40, 1  ;;  %v1747_v1 = vmul.f32 %v1468_v61, %v151_v54 }
 0x1a4   :  { %2649 = vst [vmem:[#allocation42_spill] sm:$0xff] %v1722_v41  ;;  %v1738_v43 = vmul.f32 %v1462_v59, %v158_v38  ;;  %v1741_v41 = vmul.f32 %v1465_v60, %v151_v54  ;;  %v1744_v23 = vmul.f32 %v1465_v60, %v158_v38  ;;  %v1750_v4 = vmul.f32 %v1468_v61, %v158_v38 }
 0x1a5   :  { %2652 = vst [vmem:[#allocation44_spill] sm:$0xff] %v1747_v1  ;;  %2654 = vst [vmem:[#allocation46_spill] sm:$0xff] %v1753_v42  ;;  %v1756_v40 = vmul.f32 %v1471_v62, %v158_v38  ;;  %v1759_v59 = vmul.f32 %v1478_v63, %v151_v54  ;;  %v1762_v2 = vmul.f32 %v1478_v63, %v158_v38  ;;  %v1773_v42 = vpop.permute.xlu0 %232 }
 0x1a6   :  { %2651 = vst [vmem:[#allocation43_spill] sm:$0xff] %v1744_v23  ;;  %2653 = vst [vmem:[#allocation45_spill] sm:$0xff] %v1750_v4  ;;  %v1765_v60 = vmul.f32 %v1481_v24, %v151_v54  ;;  %v1768_v15 = vmul.f32 %v1481_v24, %v158_v38  ;;  %v1771_v61 = vmul.f32 %v1484_v25, %v151_v54  ;;  %v231_v4 = vpop.permute.xlu1 %230 }
 0x1a7   :  { %2655 = vst [vmem:[#allocation47_spill] sm:$0xff] %v1756_v40  ;;  %2656 = vst [vmem:[#allocation48_spill] sm:$0xff] %v1759_v59  ;;  %v1776_v62 = vmul.f32 %v1484_v25, %v158_v38  ;;  %v1779_v59 = vmul.f32 %v1487_v26, %v151_v54  ;;  %v1782_v63 = vmul.f32 %v1487_v26, %v158_v38  ;;  %v251_v26 = vrot.slane %v231_v4, 1 }
 0x1a8   :  { %2657 = vst [vmem:[#allocation49_spill] sm:$0xff] %v1762_v2  ;;  %2658 = vst [vmem:[#allocation50_spill] sm:$0xff] %v1765_v60  ;;  %v2664_v60 = vrot.slane %v1637_v47, 1  ;;  %v261_v54 = vsel %vm150_vm1, %v249_v0, %v250_v45 }
 0x1a9   :  { %2659 = vst [vmem:[#allocation51_spill] sm:$0xff] %v1768_v15  ;;  %2660 = vst [vmem:[#allocation52_spill] sm:$0xff] %v1771_v61  ;;  %v529_v38 = vmul.f32 %v1498_v29, %v261_v54 }
 0x1aa   :  { %2661 = vst [vmem:[#allocation53_spill] sm:$0xff] %v1776_v62  ;;  %2662 = vst [vmem:[#allocation54_spill] sm:$0xff] %v1779_v59  ;;  %v262_v24 = vsel %vm150_vm1, %v2664_v60, %v249_v0 }
 0x1ab   :  { %2663 = vst [vmem:[#allocation55_spill] sm:$0xff] %v1782_v63  ;;  %v381_v15 = vmul.f32 %v1492_v27, %v262_v24  ;;  %v455_v61 = vmul.f32 %v1495_v28, %v262_v24  ;;  %v528_v2 = vmul.f32 %v1498_v29, %v262_v24  ;;  %v601_v25 = vmul.f32 %v1501_v30, %v262_v24 }
 0x1ac   :  { %v674_v62 = vmul.f32 %v1504_v33, %v262_v24  ;;  %v747_v60 = vmul.f32 %v1507_v34, %v262_v24  ;;  %v820_v59 = vmul.f32 %v1510_v35, %v262_v24  ;;  %v893_v40 = vmul.f32 %v1513_v36, %v262_v24 }
 0x1ad   :  { %v1797_v63 = vadd.f32 %v381_v15, %v1568_v49  ;;  %v1803_v1 = vadd.f32 %v455_v61, %v1571_v10  ;;  %v1806_v23 = vadd.f32 %v528_v2, %v1574_v50  ;;  %v1809_v0 = vadd.f32 %v601_v25, %v1580_v51 }
 0x1ae   :  { %v1812_v4 = vadd.f32 %v674_v62, %v1583_v12  ;;  %v382_v49 = vmul.f32 %v1492_v27, %v261_v54  ;;  %v456_v15 = vmul.f32 %v1495_v28, %v261_v54  ;;  %v602_v24 = vmul.f32 %v1501_v30, %v261_v54 }
 0x1af   :  { %2665 = vst [vmem:[#allocation56_spill] sm:$0xff] %v1809_v0  ;;  %v675_v10 = vmul.f32 %v1504_v33, %v261_v54  ;;  %v748_v61 = vmul.f32 %v1507_v34, %v261_v54  ;;  %v821_v50 = vmul.f32 %v1510_v35, %v261_v54  ;;  %v894_v51 = vmul.f32 %v1513_v36, %v261_v54 }
 0x1b0   :  { %2666 = vst [vmem:[#allocation57_spill] sm:$0xff] %v1812_v4  ;;  %v1823_v2 = vadd.f32 %v747_v60, %v1586_v52  ;;  %v1826_v12 = vadd.f32 %v820_v59, %v1589_v13  ;;  %v1829_v62 = vadd.f32 %v893_v40, %v1592_v53  ;;  %v1832_v25 = vadd.f32 %v382_v49, %v1595_v14  ;;  %v235_v13 = vpop.permute.xlu1 %234  ;;  %v1846_v59 = vpop.permute.xlu0 %236 }
 0x1b1   :  { %v1835_v4 = vadd.f32 %v456_v15, %v1598_v56  ;;  %v1838_v0 = vadd.f32 %v529_v38, %v1601_v17  ;;  %v1841_v54 = vadd.f32 %v602_v24, %v1604_v57  ;;  %v1844_v52 = vadd.f32 %v675_v10, %v1607_v18 }
 0x1b2   :  { %v1849_v53 = vadd.f32 %v748_v61, %v1610_v58  ;;  %v1852_v14 = vadd.f32 %v821_v50, %v1613_v19  ;;  %v1855_v56 = vadd.f32 %v894_v51, %v1620_v31  ;;  %v260_v17 = vsel %vm150_vm1, %v250_v45, %v251_v26 }
 0x1b3   :  { %v383_v57 = vmul.f32 %v1492_v27, %v260_v17  ;;  %v457_v18 = vmul.f32 %v1495_v28, %v260_v17  ;;  %v530_v40 = vmul.f32 %v1498_v29, %v260_v17  ;;  %v603_v38 = vmul.f32 %v1501_v30, %v260_v17 }
 0x1b4   :  { %v676_v58 = vmul.f32 %v1504_v33, %v260_v17  ;;  %v2667_v60 = vrot.slane %v1773_v42, 1  ;;  %v253_v31 = vrot.slane %v235_v13, 1  ;;  %v749_v15 = vmul.f32 %v1507_v34, %v260_v17 }
 0x1b5   :  { %v1870_v45 = vadd.f32 %v383_v57, %v1623_v32  ;;  %v822_v24 = vmul.f32 %v1510_v35, %v260_v17  ;;  %v895_v10 = vmul.f32 %v1513_v36, %v260_v17  ;;  %v1876_v61 = vadd.f32 %v457_v18, %v1626_v44 }
 0x1b6   :  { %v259_v19 = vsel %vm150_vm1, %v251_v26, %v2667_v60  ;;  %v1879_v50 = vadd.f32 %v530_v40, %v1629_v5  ;;  %v1882_v26 = vadd.f32 %v603_v38, %v1632_v37  ;;  %v1885_v51 = vadd.f32 %v676_v58, %v1635_v39 }
 0x1b7   :  { %v384_v32 = vmul.f32 %v1492_v27, %v259_v19  ;;  %v458_v13 = vmul.f32 %v1495_v28, %v259_v19  ;;  %v531_v57 = vmul.f32 %v1498_v29, %v259_v19  ;;  %v604_v17 = vmul.f32 %v1501_v30, %v259_v19 }
 0x1b8   :  { %v677_v44 = vmul.f32 %v1504_v33, %v259_v19  ;;  %v750_v18 = vmul.f32 %v1507_v34, %v259_v19  ;;  %v823_v5 = vmul.f32 %v1510_v35, %v259_v19  ;;  %v896_v37 = vmul.f32 %v1513_v36, %v259_v19 }
 0x1b9   :  { %v1896_v40 = vadd.f32 %v749_v15, %v1640_v11  ;;  %v1899_v39 = vadd.f32 %v822_v24, %v1643_v55  ;;  %v1902_v38 = vadd.f32 %v895_v10, %v1646_v16  ;;  %v1905_v58 = vadd.f32 %v384_v32, %v1649_v9  ;;  %v239_v55 = vpop.permute.xlu1 %238  ;;  %v2674_v9 = vld [vmem:[#allocation27_spill] sm:$0xff] }
 0x1ba   :  { %v1908_v60 = vadd.f32 %v458_v13, %v1652_v48  ;;  %v1911_v49 = vadd.f32 %v531_v57, %v1655_v8  ;;  %v1914_v19 = vadd.f32 %v604_v17, %v1658_v7  ;;  %v1917_v11 = vadd.f32 %v677_v44, %v1661_v46  ;;  %v1942_v17 = vpop.permute.xlu0 %329  ;;  %v2679_v44 = vld [vmem:[#allocation28_spill] sm:$0xff] }
 0x1bb   :  { %v1920_v15 = vadd.f32 %v750_v18, %v1664_v6  ;;  %v1923_v16 = vadd.f32 %v823_v5, %v1667_v20  ;;  %v1926_v24 = vadd.f32 %v896_v37, %v2674_v9  ;;  %v2676_v48 = vrot.slane %v1773_v42, 1  ;;  %2678 = vst [vmem:[#allocation64_spill] sm:$0xff] %v1942_v17 }
 0x1bc   :  { %2668 = vst [vmem:[#allocation58_spill] sm:$0xff] %v1908_v60  ;;  %2669 = vst [vmem:[#allocation59_spill] sm:$0xff] %v1911_v49  ;;  %v2677_v13 = vrot.slane %v1846_v59, 1  ;;  %v255_v57 = vrot.slane %v239_v55, 1  ;;  %v2687_v55 = vld [vmem:[#allocation32_spill] sm:$0xff] }
 0x1bd   :  { %2670 = vst [vmem:[#allocation60_spill] sm:$0xff] %v1914_v19  ;;  %2671 = vst [vmem:[#allocation61_spill] sm:$0xff] %v1917_v11  ;;  %v258_v8 = vsel %vm150_vm1, %v2676_v48, %v253_v31  ;;  %v2681_v48 = vld [vmem:[#allocation29_spill] sm:$0xff]  ;;  %v2685_v11 = vld [vmem:[#allocation31_spill] sm:$0xff] }
 0x1be   :  { %2672 = vst [vmem:[#allocation62_spill] sm:$0xff] %v1920_v15  ;;  %2673 = vst [vmem:[#allocation63_spill] sm:$0xff] %v1923_v16  ;;  %v385_v7 = vmul.f32 %v1492_v27, %v258_v8  ;;  %v459_v46 = vmul.f32 %v1495_v28, %v258_v8  ;;  %v532_v10 = vmul.f32 %v1498_v29, %v258_v8  ;;  %v2683_v16 = vld [vmem:[#allocation30_spill] sm:$0xff]  ;;  %v2698_v19 = vld [vmem:[#allocation39_spill] sm:$0xff] }
 0x1bf   :  { %2675 = vst [vmem:[#allocation27_spill] sm:$0xff] %v1926_v24  ;;  %v605_v6 = vmul.f32 %v1501_v30, %v258_v8  ;;  %v678_v32 = vmul.f32 %v1504_v33, %v258_v8  ;;  %v751_v20 = vmul.f32 %v1507_v34, %v258_v8  ;;  %v257_v42 = vsel %vm150_vm1, %v253_v31, %v2677_v13  ;;  %v2700_v60 = vld [vmem:[#allocation40_spill] sm:$0xff] }
 0x1c0   :  { %v1945_v18 = vadd.f32 %v385_v7, %v2679_v44  ;;  %v824_v5 = vmul.f32 %v1510_v35, %v258_v8  ;;  %v897_v37 = vmul.f32 %v1513_v36, %v258_v8  ;;  %v1951_v24 = vadd.f32 %v459_v46, %v2681_v48  ;;  %v2692_v48 = vld [vmem:[#allocation35_spill] sm:$0xff] }
 0x1c1   :  { %v1954_v15 = vadd.f32 %v532_v10, %v2683_v16  ;;  %v1957_v31 = vadd.f32 %v605_v6, %v2685_v11  ;;  %v1960_v13 = vadd.f32 %v678_v32, %v2687_v55  ;;  %v386_v7 = vmul.f32 %v1492_v27, %v257_v42  ;;  %v2691_v6 = vld [vmem:[#allocation34_spill] sm:$0xff] }
 0x1c2   :  { %2680 = vst [vmem:[#allocation28_spill] sm:$0xff] %v1945_v18  ;;  %2682 = vst [vmem:[#allocation29_spill] sm:$0xff] %v1951_v24  ;;  %v460_v44 = vmul.f32 %v1495_v28, %v257_v42  ;;  %v533_v8 = vmul.f32 %v1498_v29, %v257_v42  ;;  %v606_v9 = vmul.f32 %v1501_v30, %v257_v42  ;;  %v2689_v18 = vld [vmem:[#allocation33_spill] sm:$0xff] }
 0x1c3   :  { %2684 = vst [vmem:[#allocation30_spill] sm:$0xff] %v1954_v15  ;;  %2686 = vst [vmem:[#allocation31_spill] sm:$0xff] %v1957_v31  ;;  %v1967_v46 = vadd.f32 %v751_v20, %v2689_v18  ;;  %v679_v16 = vmul.f32 %v1504_v33, %v257_v42  ;;  %v752_v10 = vmul.f32 %v1507_v34, %v257_v42  ;;  %v2694_v24 = vld [vmem:[#allocation37_spill] sm:$0xff]  ;;  %v2696_v18 = vld [vmem:[#allocation38_spill] sm:$0xff] }
 0x1c4   :  { %2688 = vst [vmem:[#allocation32_spill] sm:$0xff] %v1960_v13  ;;  %v825_v11 = vmul.f32 %v1510_v35, %v257_v42  ;;  %v1973_v32 = vadd.f32 %v824_v5, %v2691_v6  ;;  %v1976_v55 = vadd.f32 %v897_v37, %v2692_v48  ;;  %v2693_v13 = vld [vmem:[#allocation36_spill] sm:$0xff]  ;;  %v898_v15 = vmul.f32 %v1513_v36, %v257_v42  ;;  %v2702_v6 = vld [vmem:[#allocation41_spill] sm:$0xff]  ;;  %v2704_v48 = vld [vmem:[#allocation42_spill] sm:$0xff] }
 0x1c5   :  { %2690 = vst [vmem:[#allocation33_spill] sm:$0xff] %v1967_v46  ;;  %v1979_v31 = vadd.f32 %v386_v7, %v2693_v13  ;;  %v1983_v20 = vadd.f32 %v460_v44, %v2694_v24  ;;  %v1986_v46 = vadd.f32 %v533_v8, %v2696_v18  ;;  %v1989_v49 = vadd.f32 %v606_v9, %v2698_v19  ;;  %v332_v9 = vpop.permute.xlu1 %331  ;;  %v2008_v44 = vpop.permute.xlu0 %333 }
 0x1c6   :  { %v1992_v5 = vadd.f32 %v679_v16, %v2700_v60  ;;  %v1995_v37 = vadd.f32 %v752_v10, %v2702_v6  ;;  %v1998_v13 = vadd.f32 %v825_v11, %v2704_v48  ;;  %v2706_v42 = vrot.slane %v1846_v59, 1 }
 0x1c7   :  { %2695 = vst [vmem:[#allocation34_spill] sm:$0xff] %v1983_v20  ;;  %2697 = vst [vmem:[#allocation35_spill] sm:$0xff] %v1986_v46  ;;  %v2707_v7 = vrot.slane %v1637_v47, 1  ;;  %v354_v48 = vrot.slane %v332_v9, 1  ;;  %v2748_v46 = vld [vmem:[#allocation21_spill] sm:$0xff] }
 0x1c8   :  { %2699 = vst [vmem:[#allocation36_spill] sm:$0xff] %v1989_v49  ;;  %2701 = vst [vmem:[#allocation37_spill] sm:$0xff] %v1992_v5  ;;  %v256_v24 = vsel %vm150_vm1, %v2706_v42, %v255_v57  ;;  %v2747_v49 = vld [vmem:[#allocation20_spill] sm:$0xff] }
 0x1c9   :  { %2703 = vst [vmem:[#allocation38_spill] sm:$0xff] %v1995_v37  ;;  %2705 = vst [vmem:[#allocation39_spill] sm:$0xff] %v1998_v13  ;;  %v263_v19 = vsel %vm150_vm1, %v255_v57, %v2707_v7  ;;  %v387_v60 = vmul.f32 %v1492_v27, %v256_v24  ;;  %v461_v16 = vmul.f32 %v1495_v28, %v256_v24  ;;  %v2714_v13 = vld [vmem:[#allocation44_spill] sm:$0xff]  ;;  %v2746_v37 = vld [vmem:[#allocation19_spill] sm:$0xff] }
 0x1ca   :  { %v388_v8 = vmul.f32 %v1492_v27, %v263_v19  ;;  %v462_v10 = vmul.f32 %v1495_v28, %v263_v19  ;;  %v534_v59 = vmul.f32 %v1498_v29, %v256_v24  ;;  %v535_v11 = vmul.f32 %v1498_v29, %v263_v19  ;;  %v2712_v29 = vld [vmem:[#allocation43_spill] sm:$0xff] }
 0x1cb   :  { %v607_v47 = vmul.f32 %v1501_v30, %v256_v24  ;;  %v608_v18 = vmul.f32 %v1501_v30, %v263_v19  ;;  %v2019_v57 = vadd.f32 %v898_v15, %v1731_v3  ;;  %v2022_v6 = vadd.f32 %v387_v60, %v1734_v21  ;;  %v2716_v60 = vld [vmem:[#allocation45_spill] sm:$0xff] }
 0x1cc   :  { %v2026_v42 = vadd.f32 %v388_v8, %v1738_v43  ;;  %v2029_v28 = vadd.f32 %v461_v16, %v1741_v41  ;;  %v2032_v7 = vadd.f32 %v462_v10, %v2712_v29  ;;  %v2035_v30 = vadd.f32 %v534_v59, %v2714_v13  ;;  %v2718_v8 = vld [vmem:[#allocation46_spill] sm:$0xff]  ;;  %v2720_v16 = vld [vmem:[#allocation47_spill] sm:$0xff]  ;;  %v2051_v59 = vpop.permute.xlu1 %335  ;;  %v2053_v29 = vpop.permute.xlu0 %337 }
 0x1cd   :  { %2708 = vst [vmem:[#allocation40_spill] sm:$0xff] %v2019_v57  ;;  %2709 = vst [vmem:[#allocation41_spill] sm:$0xff] %v2022_v6  ;;  %v680_v3 = vmul.f32 %v1504_v33, %v256_v24  ;;  %v681_v21 = vmul.f32 %v1504_v33, %v263_v19  ;;  %v753_v15 = vmul.f32 %v1507_v34, %v256_v24  ;;  %v2722_v33 = vld [vmem:[#allocation48_spill] sm:$0xff]  ;;  %v2745_v6 = vld [vmem:[#allocation57_spill] sm:$0xff] }
 0x1ce   :  { %2710 = vst [vmem:[#allocation42_spill] sm:$0xff] %v2026_v42  ;;  %2711 = vst [vmem:[#allocation65_spill] sm:$0xff] %v2029_v28  ;;  %v754_v9 = vmul.f32 %v1507_v34, %v263_v19  ;;  %v2042_v43 = vadd.f32 %v535_v11, %v2716_v60  ;;  %v2045_v41 = vadd.f32 %v607_v47, %v2718_v8  ;;  %v2728_v8 = vld [vmem:[#allocation50_spill] sm:$0xff]  ;;  %v2744_v28 = vld [vmem:[#allocation56_spill] sm:$0xff] }
 0x1cf   :  { %2713 = vst [vmem:[#allocation43_spill] sm:$0xff] %v2032_v7  ;;  %2715 = vst [vmem:[#allocation44_spill] sm:$0xff] %v2035_v30  ;;  %v2048_v10 = vadd.f32 %v608_v18, %v2720_v16  ;;  %v826_v13 = vmul.f32 %v1510_v35, %v256_v24  ;;  %v2056_v27 = vadd.f32 %v680_v3, %v2722_v33  ;;  %v2726_v18 = vld [vmem:[#allocation49_spill] sm:$0xff]  ;;  %v2732_v3 = vld [vmem:[#allocation52_spill] sm:$0xff] }
 0x1d0   :  { %2717 = vst [vmem:[#allocation45_spill] sm:$0xff] %v2042_v43  ;;  %2719 = vst [vmem:[#allocation46_spill] sm:$0xff] %v2045_v41  ;;  %v2059_v34 = vmul.f32 %v1510_v35, %v263_v19  ;;  %v2062_v11 = vmul.f32 %v1513_v36, %v256_v24  ;;  %v2065_v47 = vmul.f32 %v1513_v36, %v263_v19  ;;  %v2734_v35 = vrot.slane %v1942_v17, 1  ;;  %v2742_v43 = vld [vmem:[#allocation17_spill] sm:$0xff]  ;;  %v2743_v7 = vld [vmem:[#allocation18_spill] sm:$0xff] }
 0x1d1   :  { %2721 = vst [vmem:[#allocation47_spill] sm:$0xff] %v2048_v10  ;;  %2723 = vst [vmem:[#allocation48_spill] sm:$0xff] %v2056_v27  ;;  %v2068_v60 = vadd.f32 %v681_v21, %v2726_v18  ;;  %v2071_v16 = vadd.f32 %v753_v15, %v2728_v8  ;;  %v2730_v10 = vld [vmem:[#allocation51_spill] sm:$0xff]  ;;  %v2077_v33 = vadd.f32 %v826_v13, %v2732_v3  ;;  %v2735_v36 = vrot.slane %v2008_v44, 1  ;;  %v2738_v13 = vld [vmem:[#allocation13_spill] sm:$0xff] }
 0x1d2   :  { %2724 = vst [vmem:[#allocation66_spill] sm:$0xff] %v2062_v11  ;;  %2725 = vst [vmem:[#allocation67_spill] sm:$0xff] %v2065_v47  ;;  %v2074_v41 = vadd.f32 %v754_v9, %v2730_v10  ;;  %v367_v24 = vsel %vm150_vm1, %v2734_v35, %v354_v48  ;;  %v2736_v18 = vld [vmem:[#allocation11_spill] sm:$0xff]  ;;  %v2737_v10 = vld [vmem:[#allocation12_spill] sm:$0xff] }
 0x1d3   :  { %2727 = vst [vmem:[#allocation49_spill] sm:$0xff] %v2068_v60  ;;  %2729 = vst [vmem:[#allocation50_spill] sm:$0xff] %v2071_v16  ;;  %v366_v19 = vsel %vm150_vm1, %v354_v48, %v2735_v36  ;;  %v399_v9 = vmul.f32 %v2736_v18, %v367_v24  ;;  %v473_v8 = vmul.f32 %v2737_v10, %v367_v24  ;;  %v2740_v16 = vld [vmem:[#allocation15_spill] sm:$0xff]  ;;  %v2741_v35 = vld [vmem:[#allocation16_spill] sm:$0xff] }
 0x1d4   :  { %2731 = vst [vmem:[#allocation51_spill] sm:$0xff] %v2074_v41  ;;  %2733 = vst [vmem:[#allocation52_spill] sm:$0xff] %v2077_v33  ;;  %v546_v3 = vmul.f32 %v2738_v13, %v367_v24  ;;  %v2739_v33 = vld [vmem:[#allocation14_spill] sm:$0xff]  ;;  %v692_v60 = vmul.f32 %v2740_v16, %v367_v24  ;;  %v765_v27 = vmul.f32 %v2741_v35, %v367_v24 }
 0x1d5   :  { %v619_v41 = vmul.f32 %v2739_v33, %v367_v24  ;;  %v838_v30 = vmul.f32 %v2742_v43, %v367_v24  ;;  %v911_v48 = vmul.f32 %v2743_v7, %v367_v24  ;;  %v407_v36 = vadd.f32 %v399_v9, %v1797_v63  ;;  %v2749_v9 = vld [vmem:[#allocation22_spill] sm:$0xff] }
 0x1d6   :  { %v481_v15 = vadd.f32 %v473_v8, %v1803_v1  ;;  %v554_v21 = vadd.f32 %v546_v3, %v1806_v23  ;;  %v700_v17 = vadd.f32 %v692_v60, %v2745_v6  ;;  %v773_v47 = vadd.f32 %v765_v27, %v1823_v2  ;;  %v2750_v8 = vld [vmem:[#allocation23_spill] sm:$0xff]  ;;  %v2751_v3 = vld [vmem:[#allocation24_spill] sm:$0xff]  ;;  %v2753_v60 = vld [vmem:[#allocation26_spill] sm:$0xff] }
 0x1d7   :  { %v627_v42 = vadd.f32 %v619_v41, %v2744_v28  ;;  %v846_v11 = vadd.f32 %v838_v30, %v1826_v12  ;;  %v919_v57 = vadd.f32 %v911_v48, %v1829_v62  ;;  %v417_v5 = vadd.f32 %v2746_v37, %v407_v36  ;;  %v2752_v41 = vld [vmem:[#allocation25_spill] sm:$0xff] }
 0x1d8   :  { %v491_v24 = vadd.f32 %v2747_v49, %v481_v15  ;;  %v564_v63 = vadd.f32 %v2748_v46, %v554_v21  ;;  %v710_v23 = vadd.f32 %v2750_v8, %v700_v17  ;;  %v783_v28 = vadd.f32 %v2751_v3, %v773_v47 }
 0x1d9   :  { %v637_v1 = vadd.f32 %v2749_v9, %v627_v42  ;;  %v856_v6 = vadd.f32 %v2752_v41, %v846_v11  ;;  %v929_v2 = vadd.f32 %v2753_v60, %v919_v57  ;;  %v425_v27 = vmax.f32 %v417_v5, 0.0 }
 0x1da   :  { %v499_v12 = vmax.f32 %v491_v24, 0.0  ;;  %v572_v30 = vmax.f32 %v564_v63, 0.0  ;;  %v718_v48 = vmax.f32 %v710_v23, 0.0  ;;  %v791_v36 = vmax.f32 %v783_v28, 0.0 }
 0x1db   :  { %v645_v62 = vmax.f32 %v637_v1, 0.0  ;;  %v864_v20 = vmax.f32 %v856_v6, 0.0  ;;  %v937_v15 = vmax.f32 %v929_v2, 0.0  ;;  %434 = vst.msk [vmem:[%s2754_s15] sm:$0xff] %vm433_vm2, %v425_v27  ;;  %v400_v17 = vmul.f32 %v2736_v18, %v366_v19 }
 0x1dc   :  { %967 = vst.msk [vmem:[%s2754_s15 + $0x40] sm:$0xff] %vm433_vm2, %v499_v12  ;;  %979 = vst.msk [vmem:[%s2754_s15 + $0x80] sm:$0xff] %vm433_vm2, %v572_v30  ;;  %v474_v5 = vmul.f32 %v2737_v10, %v366_v19  ;;  %v547_v57 = vmul.f32 %v2738_v13, %v366_v19  ;;  %v620_v42 = vmul.f32 %v2739_v33, %v366_v19  ;;  %v2169_v30 = vpop.permute.xlu1 %339 }
 0x1dd   :  { %991 = vst.msk [vmem:[%s2754_s15 + $0xc0] sm:$0xff] %vm433_vm2, %v645_v62  ;;  %1003 = vst.msk [vmem:[%s2754_s15 + $0x100] sm:$0xff] %vm433_vm2, %v718_v48  ;;  %v693_v11 = vmul.f32 %v2740_v16, %v366_v19  ;;  %v766_v47 = vmul.f32 %v2741_v35, %v366_v19  ;;  %v839_v21 = vmul.f32 %v2742_v43, %v366_v19 }
 0x1de   :  { %1015 = vst.msk [vmem:[%s2754_s15 + $0x140] sm:$0xff] %vm433_vm2, %v791_v36  ;;  %1027 = vst.msk [vmem:[%s2754_s15 + $0x180] sm:$0xff] %vm433_vm2, %v864_v20  ;;  %v912_v24 = vmul.f32 %v2743_v7, %v366_v19  ;;  %v408_v63 = vadd.f32 %v400_v17, %v1832_v25  ;;  %v482_v1 = vadd.f32 %v474_v5, %v1835_v4 }
 0x1df   :  { %1039 = vst.msk [vmem:[%s2754_s15 + $0x1c0] sm:$0xff] %vm433_vm2, %v937_v15  ;;  %v555_v23 = vadd.f32 %v547_v57, %v1838_v0  ;;  %v628_v20 = vadd.f32 %v620_v42, %v1841_v54  ;;  %v701_v28 = vadd.f32 %v693_v11, %v1844_v52  ;;  %v774_v6 = vadd.f32 %v766_v47, %v1849_v53 }
 0x1e0   :  { %v847_v2 = vadd.f32 %v839_v21, %v1852_v14  ;;  %v920_v27 = vadd.f32 %v912_v24, %v1855_v56  ;;  %v418_v12 = vadd.f32 %v2746_v37, %v408_v63  ;;  %v492_v19 = vadd.f32 %v2747_v49, %v482_v1  ;;  %v2171_v14 = vpop.permute.xlu0 %341 }
 0x1e1   :  { %v565_v25 = vadd.f32 %v2748_v46, %v555_v23  ;;  %v638_v4 = vadd.f32 %v2749_v9, %v628_v20  ;;  %v711_v0 = vadd.f32 %v2750_v8, %v701_v28  ;;  %v784_v54 = vadd.f32 %v2751_v3, %v774_v6 }
 0x1e2   :  { %v857_v52 = vadd.f32 %v2752_v41, %v847_v2  ;;  %v930_v53 = vadd.f32 %v2753_v60, %v920_v27  ;;  %v426_v56 = vmax.f32 %v418_v12, 0.0  ;;  %v500_v62 = vmax.f32 %v492_v19, 0.0 }
 0x1e3   :  { %v573_v48 = vmax.f32 %v565_v25, 0.0  ;;  %v646_v36 = vmax.f32 %v638_v4, 0.0  ;;  %v719_v15 = vmax.f32 %v711_v0, 0.0  ;;  %v792_v17 = vmax.f32 %v784_v54, 0.0 }
 0x1e4   :  { %v865_v5 = vmax.f32 %v857_v52, 0.0  ;;  %v938_v57 = vmax.f32 %v930_v53, 0.0  ;;  %435 = vst.msk [vmem:[%s2754_s15 + $0x8] sm:$0xff] %vm433_vm2, %v426_v56  ;;  %968 = vst.msk [vmem:[%s2754_s15 + $0x48] sm:$0xff] %vm433_vm2, %v500_v62  ;;  %v2755_v42 = vrot.slane %v2051_v59, 1  ;;  %v2756_v11 = vrot.slane %v2008_v44, 1 }
 0x1e5   :  { %980 = vst.msk [vmem:[%s2754_s15 + $0x88] sm:$0xff] %vm433_vm2, %v573_v48  ;;  %992 = vst.msk [vmem:[%s2754_s15 + $0xc8] sm:$0xff] %vm433_vm2, %v646_v36  ;;  %v2757_v21 = vrot.slane %v2053_v29, 1  ;;  %v358_v1 = vrot.slane %v2169_v30, 1  ;;  %v359_v23 = vrot.slane %v2171_v14, 1 }
 0x1e6   :  { %v365_v47 = vsel %vm150_vm1, %v2756_v11, %v2755_v42  ;;  %v2758_v24 = vmov %v2755_v42  ;;  %1004 = vst.msk [vmem:[%s2754_s15 + $0x108] sm:$0xff] %vm433_vm2, %v719_v15  ;;  %1016 = vst.msk [vmem:[%s2754_s15 + $0x148] sm:$0xff] %vm433_vm2, %v792_v17 }
 0x1e7   :  { %v364_v63 = vsel %vm150_vm1, %v2758_v24, %v2757_v21  ;;  %1028 = vst.msk [vmem:[%s2754_s15 + $0x188] sm:$0xff] %vm433_vm2, %v865_v5  ;;  %1040 = vst.msk [vmem:[%s2754_s15 + $0x1c8] sm:$0xff] %vm433_vm2, %v938_v57  ;;  %v401_v44 = vmul.f32 %v2736_v18, %v365_v47  ;;  %v475_v59 = vmul.f32 %v2737_v10, %v365_v47 }
 0x1e8   :  { %v548_v20 = vmul.f32 %v2738_v13, %v365_v47  ;;  %v621_v28 = vmul.f32 %v2739_v33, %v365_v47  ;;  %v694_v6 = vmul.f32 %v2740_v16, %v365_v47  ;;  %v767_v2 = vmul.f32 %v2741_v35, %v365_v47 }
 0x1e9   :  { %v840_v27 = vmul.f32 %v2742_v43, %v365_v47  ;;  %v913_v12 = vmul.f32 %v2743_v7, %v365_v47  ;;  %v409_v19 = vadd.f32 %v401_v44, %v1870_v45  ;;  %v483_v25 = vadd.f32 %v475_v59, %v1876_v61 }
 0x1ea   :  { %v556_v4 = vadd.f32 %v548_v20, %v1879_v50  ;;  %v629_v0 = vadd.f32 %v621_v28, %v1882_v26  ;;  %v702_v54 = vadd.f32 %v694_v6, %v1885_v51  ;;  %v775_v52 = vadd.f32 %v767_v2, %v1896_v40  ;;  %v2759_v2 = vld [vmem:[#allocation58_spill] sm:$0xff] }
 0x1eb   :  { %v848_v53 = vadd.f32 %v840_v27, %v1899_v39  ;;  %v921_v56 = vadd.f32 %v913_v12, %v1902_v38  ;;  %v419_v62 = vadd.f32 %v2746_v37, %v409_v19  ;;  %v493_v48 = vadd.f32 %v2747_v49, %v483_v25  ;;  %v2760_v12 = vld [vmem:[#allocation59_spill] sm:$0xff]  ;;  %v2761_v25 = vld [vmem:[#allocation60_spill] sm:$0xff] }
 0x1ec   :  { %v566_v45 = vadd.f32 %v2748_v46, %v556_v4  ;;  %v639_v61 = vadd.f32 %v2749_v9, %v629_v0  ;;  %v712_v50 = vadd.f32 %v2750_v8, %v702_v54  ;;  %v785_v26 = vadd.f32 %v2751_v3, %v775_v52  ;;  %v2762_v0 = vld [vmem:[#allocation61_spill] sm:$0xff]  ;;  %v2763_v52 = vld [vmem:[#allocation62_spill] sm:$0xff] }
 0x1ed   :  { %v858_v51 = vadd.f32 %v2752_v41, %v848_v53  ;;  %v931_v40 = vadd.f32 %v2753_v60, %v921_v56  ;;  %v427_v36 = vmax.f32 %v419_v62, 0.0  ;;  %v501_v39 = vmax.f32 %v493_v48, 0.0  ;;  %v2764_v56 = vld [vmem:[#allocation63_spill] sm:$0xff] }
 0x1ee   :  { %v574_v15 = vmax.f32 %v566_v45, 0.0  ;;  %v647_v38 = vmax.f32 %v639_v61, 0.0  ;;  %v720_v17 = vmax.f32 %v712_v50, 0.0  ;;  %v793_v5 = vmax.f32 %v785_v26, 0.0  ;;  %v2765_v48 = vld [vmem:[#allocation27_spill] sm:$0xff] }
 0x1ef   :  { %v866_v57 = vmax.f32 %v858_v51, 0.0  ;;  %v939_v42 = vmax.f32 %v931_v40, 0.0  ;;  %436 = vst.msk [vmem:[%s2754_s15 + $0x10] sm:$0xff] %vm433_vm2, %v427_v36  ;;  %969 = vst.msk [vmem:[%s2754_s15 + $0x50] sm:$0xff] %vm433_vm2, %v501_v39  ;;  %v402_v11 = vmul.f32 %v2736_v18, %v364_v63  ;;  %v476_v47 = vmul.f32 %v2737_v10, %v364_v63  ;;  %v2299_v39 = vpop.permute.xlu1 %343 }
 0x1f0   :  { %981 = vst.msk [vmem:[%s2754_s15 + $0x90] sm:$0xff] %vm433_vm2, %v574_v15  ;;  %993 = vst.msk [vmem:[%s2754_s15 + $0xd0] sm:$0xff] %vm433_vm2, %v647_v38  ;;  %v549_v21 = vmul.f32 %v2738_v13, %v364_v63  ;;  %v622_v24 = vmul.f32 %v2739_v33, %v364_v63  ;;  %v695_v44 = vmul.f32 %v2740_v16, %v364_v63 }
 0x1f1   :  { %1005 = vst.msk [vmem:[%s2754_s15 + $0x110] sm:$0xff] %vm433_vm2, %v720_v17  ;;  %1017 = vst.msk [vmem:[%s2754_s15 + $0x150] sm:$0xff] %vm433_vm2, %v793_v5  ;;  %v768_v59 = vmul.f32 %v2741_v35, %v364_v63  ;;  %v841_v20 = vmul.f32 %v2742_v43, %v364_v63  ;;  %v914_v28 = vmul.f32 %v2743_v7, %v364_v63 }
 0x1f2   :  { %1029 = vst.msk [vmem:[%s2754_s15 + $0x190] sm:$0xff] %vm433_vm2, %v866_v57  ;;  %1041 = vst.msk [vmem:[%s2754_s15 + $0x1d0] sm:$0xff] %vm433_vm2, %v939_v42  ;;  %v410_v6 = vadd.f32 %v402_v11, %v1905_v58  ;;  %v484_v27 = vadd.f32 %v476_v47, %v2759_v2  ;;  %v557_v19 = vadd.f32 %v549_v21, %v2760_v12  ;;  %v2766_v21 = vld [vmem:[#allocation53_spill] sm:$0xff] }
 0x1f3   :  { %v630_v4 = vadd.f32 %v622_v24, %v2761_v25  ;;  %v703_v54 = vadd.f32 %v695_v44, %v2762_v0  ;;  %v776_v53 = vadd.f32 %v768_v59, %v2763_v52  ;;  %v849_v62 = vadd.f32 %v841_v20, %v2764_v56 }
 0x1f4   :  { %v922_v45 = vadd.f32 %v914_v28, %v2765_v48  ;;  %v420_v61 = vadd.f32 %v2746_v37, %v410_v6  ;;  %v494_v63 = vadd.f32 %v2747_v49, %v484_v27  ;;  %v567_v58 = vadd.f32 %v2748_v46, %v557_v19  ;;  %v2768_v19 = vld [vmem:[#allocation28_spill] sm:$0xff] }
 0x1f5   :  { %v640_v50 = vadd.f32 %v2749_v9, %v630_v4  ;;  %v713_v26 = vadd.f32 %v2750_v8, %v703_v54  ;;  %v786_v51 = vadd.f32 %v2751_v3, %v776_v53  ;;  %v859_v40 = vadd.f32 %v2752_v41, %v849_v62  ;;  %v2769_v4 = vld [vmem:[#allocation29_spill] sm:$0xff]  ;;  %v2770_v54 = vld [vmem:[#allocation30_spill] sm:$0xff]  ;;  %v2771_v53 = vld [vmem:[#allocation31_spill] sm:$0xff] }
 0x1f6   :  { %v932_v36 = vadd.f32 %v2753_v60, %v922_v45  ;;  %v428_v15 = vmax.f32 %v420_v61, 0.0  ;;  %v502_v38 = vmax.f32 %v494_v63, 0.0  ;;  %v575_v17 = vmax.f32 %v567_v58, 0.0  ;;  %v2772_v62 = vld [vmem:[#allocation32_spill] sm:$0xff]  ;;  %v2773_v45 = vld [vmem:[#allocation33_spill] sm:$0xff] }
 0x1f7   :  { %v648_v5 = vmax.f32 %v640_v50, 0.0  ;;  %v721_v57 = vmax.f32 %v713_v26, 0.0  ;;  %v794_v42 = vmax.f32 %v786_v51, 0.0  ;;  %v867_v11 = vmax.f32 %v859_v40, 0.0 }
 0x1f8   :  { %v940_v47 = vmax.f32 %v932_v36, 0.0  ;;  %v2303_v24 = vadd.f32 %v2059_v34, %v2766_v21  ;;  %437 = vst.msk [vmem:[%s2754_s15 + $0x18] sm:$0xff] %vm433_vm2, %v428_v15  ;;  %970 = vst.msk [vmem:[%s2754_s15 + $0x58] sm:$0xff] %vm433_vm2, %v502_v38  ;;  %v2767_v34 = vrot.slane %v2053_v29, 1  ;;  %v362_v59 = vsel %vm150_vm1, %v358_v1, %v359_v23 }
 0x1f9   :  { %982 = vst.msk [vmem:[%s2754_s15 + $0x98] sm:$0xff] %vm433_vm2, %v575_v17  ;;  %994 = vst.msk [vmem:[%s2754_s15 + $0xd8] sm:$0xff] %vm433_vm2, %v648_v5  ;;  %v360_v20 = vrot.slane %v2299_v39, 1 }
 0x1fa   :  { %v363_v44 = vsel %vm150_vm1, %v2767_v34, %v358_v1  ;;  %1006 = vst.msk [vmem:[%s2754_s15 + $0x118] sm:$0xff] %vm433_vm2, %v721_v57  ;;  %1018 = vst.msk [vmem:[%s2754_s15 + $0x158] sm:$0xff] %vm433_vm2, %v794_v42  ;;  %v404_v34 = vmul.f32 %v2736_v18, %v362_v59 }
 0x1fb   :  { %1030 = vst.msk [vmem:[%s2754_s15 + $0x198] sm:$0xff] %vm433_vm2, %v867_v11  ;;  %1042 = vst.msk [vmem:[%s2754_s15 + $0x1d8] sm:$0xff] %vm433_vm2, %v940_v47  ;;  %v403_v29 = vmul.f32 %v2736_v18, %v363_v44  ;;  %v477_v30 = vmul.f32 %v2737_v10, %v363_v44  ;;  %v550_v1 = vmul.f32 %v2738_v13, %v363_v44 }
 0x1fc   :  { %v623_v28 = vmul.f32 %v2739_v33, %v363_v44  ;;  %v696_v6 = vmul.f32 %v2740_v16, %v363_v44  ;;  %v769_v2 = vmul.f32 %v2741_v35, %v363_v44  ;;  %v842_v27 = vmul.f32 %v2742_v43, %v363_v44 }
 0x1fd   :  { %v915_v12 = vmul.f32 %v2743_v7, %v363_v44  ;;  %v411_v25 = vadd.f32 %v403_v29, %v2768_v19  ;;  %v485_v0 = vadd.f32 %v477_v30, %v2769_v4  ;;  %v558_v52 = vadd.f32 %v550_v1, %v2770_v54 }
 0x1fe   :  { %v631_v56 = vadd.f32 %v623_v28, %v2771_v53  ;;  %v704_v48 = vadd.f32 %v696_v6, %v2772_v62  ;;  %v777_v61 = vadd.f32 %v769_v2, %v2773_v45  ;;  %v850_v63 = vadd.f32 %v842_v27, %v1973_v32 }
 0x1ff   :  { %v923_v58 = vadd.f32 %v915_v12, %v1976_v55  ;;  %v421_v50 = vadd.f32 %v2746_v37, %v411_v25  ;;  %v495_v26 = vadd.f32 %v2747_v49, %v485_v0  ;;  %v568_v51 = vadd.f32 %v2748_v46, %v558_v52  ;;  %v2774_v12 = vld [vmem:[#allocation34_spill] sm:$0xff]  ;;  %v2775_v25 = vld [vmem:[#allocation35_spill] sm:$0xff]  ;;  %v2776_v0 = vld [vmem:[#allocation36_spill] sm:$0xff] }
 0x200   :  { %v641_v40 = vadd.f32 %v2749_v9, %v631_v56  ;;  %v714_v36 = vadd.f32 %v2750_v8, %v704_v48  ;;  %v787_v15 = vadd.f32 %v2751_v3, %v777_v61  ;;  %v860_v38 = vadd.f32 %v2752_v41, %v850_v63  ;;  %v2777_v52 = vld [vmem:[#allocation37_spill] sm:$0xff]  ;;  %v2778_v56 = vld [vmem:[#allocation38_spill] sm:$0xff]  ;;  %v2779_v48 = vld [vmem:[#allocation39_spill] sm:$0xff] }
 0x201   :  { %v933_v17 = vadd.f32 %v2753_v60, %v923_v58  ;;  %v429_v5 = vmax.f32 %v421_v50, 0.0  ;;  %v503_v32 = vmax.f32 %v495_v26, 0.0  ;;  %v576_v57 = vmax.f32 %v568_v51, 0.0  ;;  %v2780_v61 = vld [vmem:[#allocation40_spill] sm:$0xff] }
 0x202   :  { %v649_v55 = vmax.f32 %v641_v40, 0.0  ;;  %v722_v42 = vmax.f32 %v714_v36, 0.0  ;;  %v795_v11 = vmax.f32 %v787_v15, 0.0  ;;  %v868_v47 = vmax.f32 %v860_v38, 0.0 }
 0x203   :  { %v941_v21 = vmax.f32 %v933_v17, 0.0  ;;  %438 = vst.msk [vmem:[%s2754_s15 + $0x20] sm:$0xff] %vm433_vm2, %v429_v5  ;;  %971 = vst.msk [vmem:[%s2754_s15 + $0x60] sm:$0xff] %vm433_vm2, %v503_v32  ;;  %v478_v44 = vmul.f32 %v2737_v10, %v362_v59  ;;  %v551_v29 = vmul.f32 %v2738_v13, %v362_v59  ;;  %v624_v30 = vmul.f32 %v2739_v33, %v362_v59 }
 0x204   :  { %983 = vst.msk [vmem:[%s2754_s15 + $0xa0] sm:$0xff] %vm433_vm2, %v576_v57  ;;  %995 = vst.msk [vmem:[%s2754_s15 + $0xe0] sm:$0xff] %vm433_vm2, %v649_v55  ;;  %v697_v1 = vmul.f32 %v2740_v16, %v362_v59  ;;  %v770_v28 = vmul.f32 %v2741_v35, %v362_v59  ;;  %v843_v6 = vmul.f32 %v2742_v43, %v362_v59 }
 0x205   :  { %1007 = vst.msk [vmem:[%s2754_s15 + $0x120] sm:$0xff] %vm433_vm2, %v722_v42  ;;  %1019 = vst.msk [vmem:[%s2754_s15 + $0x160] sm:$0xff] %vm433_vm2, %v795_v11  ;;  %v916_v2 = vmul.f32 %v2743_v7, %v362_v59  ;;  %v412_v27 = vadd.f32 %v404_v34, %v1979_v31  ;;  %v486_v19 = vadd.f32 %v478_v44, %v2774_v12  ;;  %v2781_v11 = vld [vmem:[#allocation54_spill] sm:$0xff]  ;;  %v2783_v34 = vld [vmem:[#allocation55_spill] sm:$0xff] }
 0x206   :  { %1031 = vst.msk [vmem:[%s2754_s15 + $0x1a0] sm:$0xff] %vm433_vm2, %v868_v47  ;;  %1043 = vst.msk [vmem:[%s2754_s15 + $0x1e0] sm:$0xff] %vm433_vm2, %v941_v21  ;;  %v559_v4 = vadd.f32 %v551_v29, %v2775_v25  ;;  %v632_v54 = vadd.f32 %v624_v30, %v2776_v0  ;;  %v705_v53 = vadd.f32 %v697_v1, %v2777_v52  ;;  %v2782_v47 = vld [vmem:[#allocation66_spill] sm:$0xff]  ;;  %v2784_v44 = vld [vmem:[#allocation67_spill] sm:$0xff] }
 0x207   :  { %v778_v62 = vadd.f32 %v770_v28, %v2778_v56  ;;  %v851_v45 = vadd.f32 %v843_v6, %v2779_v48  ;;  %v924_v63 = vadd.f32 %v916_v2, %v2780_v61  ;;  %v422_v58 = vadd.f32 %v2746_v37, %v412_v27  ;;  %v2785_v1 = vld [vmem:[#allocation64_spill] sm:$0xff]  ;;  %v2792_v48 = vld [vmem:[#allocation45_spill] sm:$0xff] }
 0x208   :  { %v496_v59 = vadd.f32 %v2747_v49, %v486_v19  ;;  %v569_v31 = vadd.f32 %v2748_v46, %v559_v4  ;;  %v642_v50 = vadd.f32 %v2749_v9, %v632_v54  ;;  %v715_v26 = vadd.f32 %v2750_v8, %v705_v53  ;;  %v2787_v19 = vld [vmem:[#allocation41_spill] sm:$0xff]  ;;  %v2788_v4 = vld [vmem:[#allocation42_spill] sm:$0xff]  ;;  %v2790_v53 = vld [vmem:[#allocation43_spill] sm:$0xff] }
 0x209   :  { %v788_v51 = vadd.f32 %v2751_v3, %v778_v62  ;;  %v861_v40 = vadd.f32 %v2752_v41, %v851_v45  ;;  %v934_v36 = vadd.f32 %v2753_v60, %v924_v63  ;;  %v430_v15 = vmax.f32 %v422_v58, 0.0  ;;  %v2789_v54 = vld [vmem:[#allocation65_spill] sm:$0xff]  ;;  %v2791_v56 = vld [vmem:[#allocation44_spill] sm:$0xff]  ;;  %v2793_v45 = vld [vmem:[#allocation46_spill] sm:$0xff] }
 0x20a   :  { %v504_v38 = vmax.f32 %v496_v59, 0.0  ;;  %v577_v17 = vmax.f32 %v569_v31, 0.0  ;;  %v650_v5 = vmax.f32 %v642_v50, 0.0  ;;  %v723_v32 = vmax.f32 %v715_v26, 0.0  ;;  %v2794_v63 = vld [vmem:[#allocation47_spill] sm:$0xff] }
 0x20b   :  { %v796_v57 = vmax.f32 %v788_v51, 0.0  ;;  %v869_v55 = vmax.f32 %v861_v40, 0.0  ;;  %v942_v42 = vmax.f32 %v934_v36, 0.0  ;;  %v2432_v21 = vadd.f32 %v2782_v47, %v2781_v11  ;;  %439 = vst.msk [vmem:[%s2754_s15 + $0x28] sm:$0xff] %vm433_vm2, %v430_v15  ;;  %v2795_v47 = vld [vmem:[#allocation48_spill] sm:$0xff] }
 0x20c   :  { %v2436_v29 = vadd.f32 %v2784_v44, %v2783_v34  ;;  %972 = vst.msk [vmem:[%s2754_s15 + $0x68] sm:$0xff] %vm433_vm2, %v504_v38  ;;  %984 = vst.msk [vmem:[%s2754_s15 + $0xa8] sm:$0xff] %vm433_vm2, %v577_v17  ;;  %v361_v30 = vsel %vm150_vm1, %v359_v23, %v360_v20  ;;  %v2786_v28 = vrot.slane %v2785_v1, 1  ;;  %v2796_v44 = vld [vmem:[#allocation49_spill] sm:$0xff] }
 0x20d   :  { %996 = vst.msk [vmem:[%s2754_s15 + $0xe8] sm:$0xff] %vm433_vm2, %v650_v5  ;;  %1008 = vst.msk [vmem:[%s2754_s15 + $0x128] sm:$0xff] %vm433_vm2, %v723_v32  ;;  %v405_v22 = vmul.f32 %v2736_v18, %v361_v30  ;;  %v479_v23 = vmul.f32 %v2737_v10, %v361_v30  ;;  %v625_v27 = vmul.f32 %v2739_v33, %v361_v30 }
 0x20e   :  { %v368_v6 = vsel %vm150_vm1, %v360_v20, %v2786_v28  ;;  %1020 = vst.msk [vmem:[%s2754_s15 + $0x168] sm:$0xff] %vm433_vm2, %v796_v57  ;;  %1032 = vst.msk [vmem:[%s2754_s15 + $0x1a8] sm:$0xff] %vm433_vm2, %v869_v55  ;;  %v552_v20 = vmul.f32 %v2738_v13, %v361_v30  ;;  %v2797_v28 = vld [vmem:[#allocation50_spill] sm:$0xff] }
 0x20f   :  { %1044 = vst.msk [vmem:[%s2754_s15 + $0x1e8] sm:$0xff] %vm433_vm2, %v942_v42  ;;  %v406_v14 = vmul.f32 %v2736_v18, %v368_v6  ;;  %v480_v39 = vmul.f32 %v2737_v10, %v368_v6  ;;  %v553_v2 = vmul.f32 %v2738_v13, %v368_v6  ;;  %v626_v12 = vmul.f32 %v2739_v33, %v368_v6 }
 0x210   :  { %v413_v25 = vadd.f32 %v405_v22, %v2787_v19  ;;  %v487_v52 = vadd.f32 %v479_v23, %v2789_v54  ;;  %v560_v62 = vadd.f32 %v552_v20, %v2791_v56  ;;  %v633_v61 = vadd.f32 %v625_v27, %v2793_v45 }
 0x211   :  { %v414_v0 = vadd.f32 %v406_v14, %v2788_v4  ;;  %v488_v18 = vadd.f32 %v480_v39, %v2790_v53  ;;  %v561_v10 = vadd.f32 %v553_v2, %v2792_v48  ;;  %v634_v13 = vadd.f32 %v626_v12, %v2794_v63  ;;  %v2798_v14 = vld [vmem:[#allocation51_spill] sm:$0xff]  ;;  %v2799_v39 = vld [vmem:[#allocation52_spill] sm:$0xff] }
 0x212   :  { %v423_v58 = vadd.f32 %v2746_v37, %v413_v25  ;;  %v497_v59 = vadd.f32 %v2747_v49, %v487_v52  ;;  %v570_v50 = vadd.f32 %v2748_v46, %v560_v62  ;;  %v643_v51 = vadd.f32 %v2749_v9, %v633_v61 }
 0x213   :  { %v424_v33 = vadd.f32 %v2746_v37, %v414_v0  ;;  %v498_v31 = vadd.f32 %v2747_v49, %v488_v18  ;;  %v571_v26 = vadd.f32 %v2748_v46, %v561_v10  ;;  %v644_v40 = vadd.f32 %v2749_v9, %v634_v13 }
 0x214   :  { %v431_v36 = vmax.f32 %v423_v58, 0.0  ;;  %v505_v38 = vmax.f32 %v497_v59, 0.0  ;;  %v578_v5 = vmax.f32 %v570_v50, 0.0  ;;  %v651_v57 = vmax.f32 %v643_v51, 0.0 }
 0x215   :  { %v432_v15 = vmax.f32 %v424_v33, 0.0  ;;  %v506_v17 = vmax.f32 %v498_v31, 0.0  ;;  %v579_v32 = vmax.f32 %v571_v26, 0.0  ;;  %v652_v37 = vmax.f32 %v644_v40, 0.0 }
 0x216   :  { %440 = vst.msk [vmem:[%s2754_s15 + $0x30] sm:$0xff] %vm433_vm2, %v431_v36  ;;  %973 = vst.msk [vmem:[%s2754_s15 + $0x70] sm:$0xff] %vm433_vm2, %v505_v38  ;;  %v698_v49 = vmul.f32 %v2740_v16, %v361_v30  ;;  %v699_v46 = vmul.f32 %v2740_v16, %v368_v6  ;;  %v771_v9 = vmul.f32 %v2741_v35, %v361_v30 }
 0x217   :  { %442 = vst.msk [vmem:[%s2754_s15 + $0x38] sm:$0x7f] %vm441_vm3, %v432_v15  ;;  %974 = vst.msk [vmem:[%s2754_s15 + $0x78] sm:$0x7f] %vm441_vm3, %v506_v17  ;;  %v772_v55 = vmul.f32 %v2741_v35, %v368_v6  ;;  %v844_v16 = vmul.f32 %v2742_v43, %v361_v30  ;;  %v845_v35 = vmul.f32 %v2742_v43, %v368_v6 }
 0x218   :  { %985 = vst.msk [vmem:[%s2754_s15 + $0xb0] sm:$0xff] %vm433_vm2, %v578_v5  ;;  %997 = vst.msk [vmem:[%s2754_s15 + $0xf0] sm:$0xff] %vm433_vm2, %v651_v57  ;;  %v917_v42 = vmul.f32 %v2743_v7, %v361_v30  ;;  %v918_v11 = vmul.f32 %v2743_v7, %v368_v6  ;;  %v706_v34 = vadd.f32 %v698_v49, %v2795_v47 }
 0x219   :  { %986 = vst.msk [vmem:[%s2754_s15 + $0xb8] sm:$0x7f] %vm441_vm3, %v579_v32  ;;  %998 = vst.msk [vmem:[%s2754_s15 + $0xf8] sm:$0x7f] %vm441_vm3, %v652_v37  ;;  %v707_v1 = vadd.f32 %v699_v46, %v2796_v44  ;;  %v779_v22 = vadd.f32 %v771_v9, %v2797_v28  ;;  %v780_v23 = vadd.f32 %v772_v55, %v2798_v14 }
 0x21a   :  { %v852_v20 = vadd.f32 %v844_v16, %v2799_v39  ;;  %v853_v2 = vadd.f32 %v845_v35, %v2303_v24  ;;  %v925_v27 = vadd.f32 %v917_v42, %v2432_v21  ;;  %v926_v43 = vadd.f32 %v918_v11, %v2436_v29 }
 0x21b   :  { %v716_v30 = vadd.f32 %v2750_v8, %v706_v34  ;;  %v717_v7 = vadd.f32 %v2750_v8, %v707_v1  ;;  %v789_v6 = vadd.f32 %v2751_v3, %v779_v22  ;;  %v790_v12 = vadd.f32 %v2751_v3, %v780_v23 }
 0x21c   :  { %v862_v19 = vadd.f32 %v2752_v41, %v852_v20  ;;  %v863_v25 = vadd.f32 %v2752_v41, %v853_v2  ;;  %v935_v4 = vadd.f32 %v2753_v60, %v925_v27  ;;  %v936_v24 = vadd.f32 %v2753_v60, %v926_v43 }
 0x21d   :  { %v724_v0 = vmax.f32 %v716_v30, 0.0  ;;  %v725_v21 = vmax.f32 %v717_v7, 0.0  ;;  %v797_v54 = vmax.f32 %v789_v6, 0.0  ;;  %v798_v29 = vmax.f32 %v790_v12, 0.0 }
 0x21e   :  { %v870_v52 = vmax.f32 %v862_v19, 0.0  ;;  %v871_v53 = vmax.f32 %v863_v25, 0.0  ;;  %v943_v18 = vmax.f32 %v935_v4, 0.0  ;;  %v944_v8 = vmax.f32 %v936_v24, 0.0 }
 0x21f   :  { %1009 = vst.msk [vmem:[%s2754_s15 + $0x130] sm:$0xff] %vm433_vm2, %v724_v0  ;;  %1021 = vst.msk [vmem:[%s2754_s15 + $0x170] sm:$0xff] %vm433_vm2, %v797_v54 }
 0x220   :  { %1010 = vst.msk [vmem:[%s2754_s15 + $0x138] sm:$0x7f] %vm441_vm3, %v725_v21  ;;  %1022 = vst.msk [vmem:[%s2754_s15 + $0x178] sm:$0x7f] %vm441_vm3, %v798_v29 }
 0x221   :  { %1033 = vst.msk [vmem:[%s2754_s15 + $0x1b0] sm:$0xff] %vm433_vm2, %v870_v52  ;;  %1045 = vst.msk [vmem:[%s2754_s15 + $0x1f0] sm:$0xff] %vm433_vm2, %v943_v18 }
 0x222   :  { %1034 = vst.msk [vmem:[%s2754_s15 + $0x1b8] sm:$0x7f] %vm441_vm3, %v871_v53  ;;  %1046 = vst.msk [vmem:[%s2754_s15 + $0x1f8] sm:$0x7f] %vm441_vm3, %v944_v8 }
 0x223   :  { %958 = vsyncpa [#allocation3], 1 }
 0x224   :  { %959 = vsyncpa [#allocation4], 1 }
 0x225   :  { %960 = vsyncpa [#allocation5], 1 }

</bundles_post_ra>
